<compile_context>
chip_gen: v6e
topology: v6e:2x2x1
jax: 0.10.0
libtpu: 0.0.40
codegen_flags: <defaults>
</compile_context>

<pallas_src>
import numpy as np
import jax
import jax.numpy as jnp
from jax.experimental import pallas as pl
from jax.experimental.pallas import tpu as pltpu

EPS = 1e-5  # InstanceNorm2d default eps


# ----------------------------- Pallas kernel -----------------------------

def fused_kernel(x_ref, *args):
    """Whole MetricGAN discriminator forward for one block of TB samples.

    args = [Rb_1, Wcat_1, Bsum_1, S2_1, St2g_1, Bexp_1, aff_1,
            ... (x4 layers) ...,
            w1, b1, a_fc, w2, b2, slope, o_ref]
    """
    o_ref = args[-1]
    w1_ref, b1_ref, afc_ref, w2_ref, b2_ref, slope_ref = args[-7:-1]
    TB = o_ref.shape[1]

    h = x_ref[...]                                          # (TB*H, W*Cin) bf16

    for l in range(4):
        (Rb_ref, Wcat_ref, Bsum_ref, S2_ref,
         St2g_ref, Bexp_ref, aff_ref) = args[7 * l:7 * l + 7]
        KH = Rb_ref.shape[0]
        Cout = S2_ref.shape[1] // 2
        WoCout = S2_ref.shape[0] // 2
        Ho = Bexp_ref.shape[0] // TB
        Wo = WoCout // Cout
        inv_n = 1.0 / float(Ho * Wo)

        hb = h.astype(jnp.bfloat16)

        # --- Conv2d(4x4, stride 2, pad 1, bias=False), spectral-normalized ---
        # stride-2 row gathers (incl. zero padding) as exact 0/1 bf16 matmuls,
        # fused along K into one (TB*Ho, KH*Win*Cin) @ (KH*Win*Cin, Wo*Cout)
        # banded-weight matmul (K = 256 for ndf=4).
        hsel = [jnp.dot(Rb_ref[i], hb, preferred_element_type=jnp.float32)
                for i in range(KH)]
        hcat = jnp.concatenate(hsel, axis=-1).astype(jnp.bfloat16)
        acc = jnp.dot(hcat, Wcat_ref[...],
                      preferred_element_type=jnp.float32)   # (TB*Ho, Wo*Cout) f32

        # --- InstanceNorm2d(affine=True), one-pass per-(sample,channel) stats ---
        # TODO(synk): one-pass E[x^2]-E[x]^2 variance (clamped at 0); torch uses
        # the numerically equivalent but better-conditioned two-pass form.
        st_in = jnp.concatenate([acc, acc * acc], axis=-1)   # (TB*Ho, 2*WoCout)
        rowstats = jnp.dot(Bsum_ref[...], st_in,
                           preferred_element_type=jnp.float32)        # (TB, 2*WoCout)
        chanstats = jnp.dot(rowstats, S2_ref[...],
                            preferred_element_type=jnp.float32) * inv_n  # (TB, 2*Cout)
        mean = chanstats[:, :Cout]
        var = jnp.maximum(chanstats[:, Cout:] - mean * mean, 0.0)
        inv = jax.lax.rsqrt(var + EPS)                        # (TB, Cout)
        # scale = gamma*inv, shift = -gamma*mean*inv ; gamma is folded into St2g
        sc_sh = jnp.concatenate([inv, -mean * inv], axis=-1)  # (TB, 2*Cout)
        sc_sh_w = jnp.dot(sc_sh, St2g_ref[...],
                          preferred_element_type=jnp.float32)  # (TB, 2*WoCout)
        full = jnp.dot(Bexp_ref[...], sc_sh_w,
                       preferred_element_type=jnp.float32)     # (TB*Ho, 2*WoCout)
        zn = acc * full[:, :WoCout] + full[:, WoCout:] + aff_ref[0:1]  # + beta
        # --- PReLU (per-channel alpha, tiled over lanes) ---
        h = jnp.where(zn > 0, zn, aff_ref[1:2] * zn)

    # --- AdaptiveMaxPool2d(1) + Flatten ---
    C8 = w1_ref.shape[0]
    Wo4 = h.shape[1] // C8
    Ho4 = h.shape[0] // TB
    m = h[:, 0:C8]
    for wo in range(1, Wo4):                                  # max over W groups (lanes)
        m = jnp.maximum(m, h[:, wo * C8:(wo + 1) * C8])
    rows = [jnp.max(m[b * Ho4:(b + 1) * Ho4], axis=0, keepdims=True)
            for b in range(TB)]                               # max over H rows per sample
    p = rows[0] if TB == 1 else jnp.concatenate(rows, axis=0)  # (TB, C8)

    # --- Linear + Dropout + PReLU + Linear + LearnableSigmoid(beta=1) ---
    z1 = jnp.dot(p, w1_ref[...], preferred_element_type=jnp.float32) + b1_ref[...]
    # TODO(synk): Dropout(0.3) is treated as eval-mode identity (no RNG mask).
    z1 = jnp.where(z1 > 0, z1, afc_ref[...] * z1)
    z2 = jnp.dot(z1, w2_ref[...], preferred_element_type=jnp.float32) + b2_ref[...]
    o_ref[0] = jax.nn.sigmoid(slope_ref[...] * z2)


# ----------------------------- wrapper -----------------------------

def _const_spec(a):
    n = a.ndim
    return pl.BlockSpec(a.shape, lambda g, n=n: (0,) * n)


def metricgan_discriminator(params, x, y):
    """x, y: (B, 1, H, W) float32 (PyTorch NCHW convention).  Returns (B, 1)."""
    B = x.shape[0]
    TB = params["TB"]
    assert B % TB == 0, "batch must be divisible by the batch block"
    xy = jnp.concatenate([x, y], axis=1)                    # (B, 2, H, W)
    h0 = jnp.transpose(xy, (0, 2, 3, 1))                    # NCHW -> NHWC
    _, H, W, Cin = h0.shape
    # batched row-flattened NHWC, fed in bf16 (only recurring HBM DMA)
    h0 = h0.reshape(B * H, W * Cin).astype(jnp.bfloat16)

    inputs = [h0]
    in_specs = [pl.BlockSpec((TB * H, W * Cin), lambda g: (g, 0))]
    for layer_consts in params["layers"]:
        for a in layer_consts:
            inputs.append(a)
            in_specs.append(_const_spec(a))
    for name in ("w1", "b1", "a_fc", "w2", "b2", "slope"):
        a = params[name]
        inputs.append(a)
        in_specs.append(_const_spec(a))

    G = B // TB
    out = pl.pallas_call(
        fused_kernel,
        out_shape=jax.ShapeDtypeStruct((G, TB, 1), jnp.float32),
        grid=(G,),
        in_specs=in_specs,
        out_specs=pl.BlockSpec((1, TB, 1), lambda g: (g, 0, 0)),
        compiler_params=pltpu.CompilerParams(dimension_semantics=("parallel",)),
    )(*inputs)
    return out.reshape(B, 1)


# ------------------ glue / init (plain JAX + numpy, runs once) ------------------

def spectral_sigma(w2d, iters=30):
    """Largest singular value via power iteration (spectral_norm preprocessing)."""
    # TODO(synk): torch spectral_norm keeps a persistent random u and does one
    # iteration per forward; this offline power iteration matches the limit, not
    # torch's exact per-step estimate.
    u = jnp.ones((w2d.shape[0],), jnp.float32)
    v = jnp.ones((w2d.shape[1],), jnp.float32)
    for _ in range(iters):
        v = w2d.T @ u
        v = v / (jnp.linalg.norm(v) + 1e-12)
        u = w2d @ v
        u = u / (jnp.linalg.norm(u) + 1e-12)
    return u @ (w2d @ v)


def build_layer_consts(w_oihw, gamma, beta, alpha, Hin, Win, TB):
    """Kernel-ready constants for one conv block (batched over TB samples).

    Returns (Rb, Wcat, Bsum, S2, St2g, Bexp, aff):
      Rb   (4, TB*Ho, TB*Hin)        stride-2 row selection (0/1, padding), block-diag over samples, bf16
      Wcat (4*Win*Cin, Wo*Cout)      K-fused banded conv weights, bf16
      Bsum (TB, TB*Ho)               per-sample row-sum matrix, f32
      S2   (2*Wo*Cout, 2*Cout)       block-diag channel-sum matrix (for [acc | acc^2]), f32
      St2g (2*Cout, 2*Wo*Cout)       block-diag channel-broadcast with gamma folded in, f32
      Bexp (TB*Ho, TB)               per-sample row-broadcast matrix (= Bsum^T), f32
      aff  (2, Wo*Cout)              tiled [beta; prelu_alpha], f32
    """
    Cout, Cin, KH, KW = w_oihw.shape
    Ho, Wo = Hin // 2, Win // 2
    WC = Win * Cin

    Rb = np.zeros((KH, TB * Ho, TB * Hin), np.float32)
    for i in range(KH):
        rows = 2 * np.arange(Ho) + i - 1                    # padded-row -> input-row
        valid = (rows >= 0) & (rows < Hin)
        R = np.zeros((Ho, Hin), np.float32)
        R[np.arange(Ho)[valid], rows[valid]] = 1.0
        Rb[i] = np.kron(np.eye(TB, dtype=np.float32), R)

    Wcat = np.zeros((KH * WC, Wo * Cout), np.float32)
    for i in range(KH):
        for j in range(KW):
            P = np.zeros((Win, Wo), np.float32)
            cols = 2 * np.arange(Wo) + j - 1
            valid = (cols >= 0) & (cols < Win)
            P[cols[valid], np.arange(Wo)[valid]] = 1.0
            Wcat[i * WC:(i + 1) * WC] += np.kron(P, w_oihw[:, :, i, j].T)

    Bsum = np.kron(np.eye(TB, dtype=np.float32), np.ones((1, Ho), np.float32))
    Bexp = np.ascontiguousarray(Bsum.T)
    S = np.kron(np.ones((Wo, 1), np.float32), np.eye(Cout, dtype=np.float32))
    Z = np.zeros_like(S)
    S2 = np.block([[S, Z], [Z, S]])
    Stg = np.kron(np.ones((1, Wo), np.float32), np.diag(gamma)).astype(np.float32)
    Zt = np.zeros_like(Stg)
    St2g = np.block([[Stg, Zt], [Zt, Stg]])
    aff = np.stack([np.tile(beta, Wo), np.tile(alpha, Wo)], 0)

    return (jnp.asarray(Rb, jnp.bfloat16),
            jnp.asarray(Wcat, jnp.bfloat16),
            jnp.asarray(Bsum, jnp.float32),
            jnp.asarray(S2, jnp.float32),
            jnp.asarray(St2g, jnp.float32),
            jnp.asarray(Bexp, jnp.float32),
            jnp.asarray(aff, jnp.float32))


def init_params(key, ndf, in_channel=2, H=32, W=32, batch_block=2):
    # batch_block = samples per grid step.  Default: whole batch in one step.
    # (On v7x with larger batches, use batch_block = B // 2 so both TensorCores
    #  get a grid step each.)
    chans = [in_channel, ndf, 2 * ndf, 4 * ndf, 8 * ndf]
    keys = jax.random.split(key, 8)

    layers = []
    Hin, Win = H, W
    for li in range(4):
        cin, cout = chans[li], chans[li + 1]
        w = 0.1 * jax.random.normal(keys[li], (cout, cin, 4, 4), jnp.float32)
        w = w / spectral_sigma(w.reshape(cout, -1))          # spectral_norm
        gamma = np.ones((cout,), np.float32)                 # InstanceNorm weight
        beta = np.zeros((cout,), np.float32)                 # InstanceNorm bias
        alpha = np.full((cout,), 0.25, np.float32)           # PReLU(cout) init
        layers.append(build_layer_consts(np.asarray(w, np.float32),
                                         gamma, beta, alpha, Hin, Win, batch_block))
        Hin, Win = Hin // 2, Win // 2

    c8, c4 = 8 * ndf, 4 * ndf
    w1 = 0.1 * jax.random.normal(keys[4], (c4, c8), jnp.float32)
    w1 = w1 / spectral_sigma(w1)
    b1 = 0.01 * jax.random.normal(keys[5], (1, c4), jnp.float32)
    a_fc = jnp.full((1, c4), 0.25, jnp.float32)              # PReLU(4*ndf)
    w2 = 0.1 * jax.random.normal(keys[6], (1, c4), jnp.float32)
    w2 = w2 / spectral_sigma(w2)
    b2 = 0.01 * jax.random.normal(keys[7], (1, 1), jnp.float32)
    slope = jnp.ones((1, 1), jnp.float32)                    # LearnableSigmoid(1)

    return dict(TB=batch_block, layers=layers,
                w1=jnp.transpose(w1), b1=b1, a_fc=a_fc,
                w2=jnp.transpose(w2), b2=b2, slope=slope)


# ----------------------------- main -----------------------------

if __name__ == "__main__":
    ndf = 4
    B, H, W = 2, 32, 32
    key = jax.random.PRNGKey(0)
    kp, kx, ky = jax.random.split(key, 3)
    params = init_params(kp, ndf, in_channel=2, H=H, W=W, batch_block=B)
    x = jax.random.normal(kx, (B, 1, H, W), jnp.float32)
    y = jax.random.normal(ky, (B, 1, H, W), jnp.float32)

    out = metricgan_discriminator(params, x, y)
    out = jax.block_until_ready(out)
    assert out.shape == (B, 1)
    assert bool(jnp.all(jnp.isfinite(out)))
    print("KERNEL_OK")
</pallas_src>

<mosaic_0001>
module attributes {stable_mosaic.version = 11 : i64} {
  func.func @fused_kernel(%arg0: i32, %arg1: memref<64x64xbf16, #tpu.memory_space<vmem>>, %arg2: memref<4x32x64xbf16, #tpu.memory_space<vmem>>, %arg3: memref<256x64xbf16, #tpu.memory_space<vmem>>, %arg4: memref<2x32xf32, #tpu.memory_space<vmem>>, %arg5: memref<128x8xf32, #tpu.memory_space<vmem>>, %arg6: memref<8x128xf32, #tpu.memory_space<vmem>>, %arg7: memref<32x2xf32, #tpu.memory_space<vmem>>, %arg8: memref<2x64xf32, #tpu.memory_space<vmem>>, %arg9: memref<4x16x32xbf16, #tpu.memory_space<vmem>>, %arg10: memref<256x64xbf16, #tpu.memory_space<vmem>>, %arg11: memref<2x16xf32, #tpu.memory_space<vmem>>, %arg12: memref<128x16xf32, #tpu.memory_space<vmem>>, %arg13: memref<16x128xf32, #tpu.memory_space<vmem>>, %arg14: memref<16x2xf32, #tpu.memory_space<vmem>>, %arg15: memref<2x64xf32, #tpu.memory_space<vmem>>, %arg16: memref<4x8x16xbf16, #tpu.memory_space<vmem>>, %arg17: memref<256x64xbf16, #tpu.memory_space<vmem>>, %arg18: memref<2x8xf32, #tpu.memory_space<vmem>>, %arg19: memref<128x32xf32, #tpu.memory_space<vmem>>, %arg20: memref<32x128xf32, #tpu.memory_space<vmem>>, %arg21: memref<8x2xf32, #tpu.memory_space<vmem>>, %arg22: memref<2x64xf32, #tpu.memory_space<vmem>>, %arg23: memref<4x4x8xbf16, #tpu.memory_space<vmem>>, %arg24: memref<256x64xbf16, #tpu.memory_space<vmem>>, %arg25: memref<2x4xf32, #tpu.memory_space<vmem>>, %arg26: memref<128x64xf32, #tpu.memory_space<vmem>>, %arg27: memref<64x128xf32, #tpu.memory_space<vmem>>, %arg28: memref<4x2xf32, #tpu.memory_space<vmem>>, %arg29: memref<2x64xf32, #tpu.memory_space<vmem>>, %arg30: memref<32x16xf32, #tpu.memory_space<vmem>>, %arg31: memref<1x16xf32, #tpu.memory_space<vmem>>, %arg32: memref<1x16xf32, #tpu.memory_space<vmem>>, %arg33: memref<16x1xf32, #tpu.memory_space<vmem>>, %arg34: memref<1x1xf32, #tpu.memory_space<vmem>>, %arg35: memref<1x1xf32, #tpu.memory_space<vmem>>, %arg36: memref<1x2x1xf32, #tpu.memory_space<vmem>>) attributes {dimension_semantics = [#tpu.dimension_semantics<parallel>], iteration_bounds = array<i64: 1>, scalar_prefetch = 0 : i64, scratch_operands = 0 : i64, tpu.core_type = #tpu.core_type<tc>, window_params = [{transform_indices = @transform_0, window_bounds = array<i64: 64, 64>}, {pipeline_mode = #tpu.pipeline_mode<synchronous>, transform_indices = @transform_1, window_bounds = array<i64: 4, 32, 64>}, {pipeline_mode = #tpu.pipeline_mode<synchronous>, transform_indices = @transform_2, window_bounds = array<i64: 256, 64>}, {pipeline_mode = #tpu.pipeline_mode<synchronous>, transform_indices = @transform_3, window_bounds = array<i64: 2, 32>}, {pipeline_mode = #tpu.pipeline_mode<synchronous>, transform_indices = @transform_4, window_bounds = array<i64: 128, 8>}, {pipeline_mode = #tpu.pipeline_mode<synchronous>, transform_indices = @transform_5, window_bounds = array<i64: 8, 128>}, {pipeline_mode = #tpu.pipeline_mode<synchronous>, transform_indices = @transform_6, window_bounds = array<i64: 32, 2>}, {pipeline_mode = #tpu.pipeline_mode<synchronous>, transform_indices = @transform_7, window_bounds = array<i64: 2, 64>}, {pipeline_mode = #tpu.pipeline_mode<synchronous>, transform_indices = @transform_8, window_bounds = array<i64: 4, 16, 32>}, {pipeline_mode = #tpu.pipeline_mode<synchronous>, transform_indices = @transform_9, window_bounds = array<i64: 256, 64>}, {pipeline_mode = #tpu.pipeline_mode<synchronous>, transform_indices = @transform_10, window_bounds = array<i64: 2, 16>}, {pipeline_mode = #tpu.pipeline_mode<synchronous>, transform_indices = @transform_11, window_bounds = array<i64: 128, 16>}, {pipeline_mode = #tpu.pipeline_mode<synchronous>, transform_indices = @transform_12, window_bounds = array<i64: 16, 128>}, {pipeline_mode = #tpu.pipeline_mode<synchronous>, transform_indices = @transform_13, window_bounds = array<i64: 16, 2>}, {pipeline_mode = #tpu.pipeline_mode<synchronous>, transform_indices = @transform_14, window_bounds = array<i64: 2, 64>}, {pipeline_mode = #tpu.pipeline_mode<synchronous>, transform_indices = @transform_15, window_bounds = array<i64: 4, 8, 16>}, {pipeline_mode = #tpu.pipeline_mode<synchronous>, transform_indices = @transform_16, window_bounds = array<i64: 256, 64>}, {pipeline_mode = #tpu.pipeline_mode<synchronous>, transform_indices = @transform_17, window_bounds = array<i64: 2, 8>}, {pipeline_mode = #tpu.pipeline_mode<synchronous>, transform_indices = @transform_18, window_bounds = array<i64: 128, 32>}, {pipeline_mode = #tpu.pipeline_mode<synchronous>, transform_indices = @transform_19, window_bounds = array<i64: 32, 128>}, {pipeline_mode = #tpu.pipeline_mode<synchronous>, transform_indices = @transform_20, window_bounds = array<i64: 8, 2>}, {pipeline_mode = #tpu.pipeline_mode<synchronous>, transform_indices = @transform_21, window_bounds = array<i64: 2, 64>}, {pipeline_mode = #tpu.pipeline_mode<synchronous>, transform_indices = @transform_22, window_bounds = array<i64: 4, 4, 8>}, {pipeline_mode = #tpu.pipeline_mode<synchronous>, transform_indices = @transform_23, window_bounds = array<i64: 256, 64>}, {pipeline_mode = #tpu.pipeline_mode<synchronous>, transform_indices = @transform_24, window_bounds = array<i64: 2, 4>}, {pipeline_mode = #tpu.pipeline_mode<synchronous>, transform_indices = @transform_25, window_bounds = array<i64: 128, 64>}, {pipeline_mode = #tpu.pipeline_mode<synchronous>, transform_indices = @transform_26, window_bounds = array<i64: 64, 128>}, {pipeline_mode = #tpu.pipeline_mode<synchronous>, transform_indices = @transform_27, window_bounds = array<i64: 4, 2>}, {pipeline_mode = #tpu.pipeline_mode<synchronous>, transform_indices = @transform_28, window_bounds = array<i64: 2, 64>}, {pipeline_mode = #tpu.pipeline_mode<synchronous>, transform_indices = @transform_29, window_bounds = array<i64: 32, 16>}, {pipeline_mode = #tpu.pipeline_mode<synchronous>, transform_indices = @transform_30, window_bounds = array<i64: 1, 16>}, {pipeline_mode = #tpu.pipeline_mode<synchronous>, transform_indices = @transform_31, window_bounds = array<i64: 1, 16>}, {pipeline_mode = #tpu.pipeline_mode<synchronous>, transform_indices = @transform_32, window_bounds = array<i64: 16, 1>}, {pipeline_mode = #tpu.pipeline_mode<synchronous>, transform_indices = @transform_33, window_bounds = array<i64: 1, 1>}, {pipeline_mode = #tpu.pipeline_mode<synchronous>, transform_indices = @transform_34, window_bounds = array<i64: 1, 1>}, {transform_indices = @transform_35, window_bounds = array<i64: 1, 2, 1>}]} {
    %c0 = arith.constant 0 : index
    %c0_0 = arith.constant 0 : index
    %0 = vector.load %arg1[%c0, %c0_0] : memref<64x64xbf16, #tpu.memory_space<vmem>>, vector<64x64xbf16>
    %c0_1 = arith.constant 0 : index
    %c0_2 = arith.constant 0 : index
    %c0_3 = arith.constant 0 : index
    %1 = vector.load %arg2[%c0_1, %c0_2, %c0_3] : memref<4x32x64xbf16, #tpu.memory_space<vmem>>, vector<1x32x64xbf16>
    %2 = vector.shape_cast %1 : vector<1x32x64xbf16> to vector<32x64xbf16>
    %cst = arith.constant dense<0.000000e+00> : vector<32x64xf32>
    %3 = tpu.matmul %2, %0, %cst {dimension_numbers = #tpu.dot_dimension_numbers<[1], [0], [0], [1], [0, 0, 1, 1], [], []>} : vector<32x64xbf16>, vector<64x64xbf16>, vector<32x64xf32> -> vector<32x64xf32>
    %c1 = arith.constant 1 : index
    %c0_4 = arith.constant 0 : index
    %c0_5 = arith.constant 0 : index
    %4 = vector.load %arg2[%c1, %c0_4, %c0_5] : memref<4x32x64xbf16, #tpu.memory_space<vmem>>, vector<1x32x64xbf16>
    %5 = vector.shape_cast %4 : vector<1x32x64xbf16> to vector<32x64xbf16>
    %cst_6 = arith.constant dense<0.000000e+00> : vector<32x64xf32>
    %6 = tpu.matmul %5, %0, %cst_6 {dimension_numbers = #tpu.dot_dimension_numbers<[1], [0], [0], [1], [0, 0, 1, 1], [], []>} : vector<32x64xbf16>, vector<64x64xbf16>, vector<32x64xf32> -> vector<32x64xf32>
    %c2 = arith.constant 2 : index
    %c0_7 = arith.constant 0 : index
    %c0_8 = arith.constant 0 : index
    %7 = vector.load %arg2[%c2, %c0_7, %c0_8] : memref<4x32x64xbf16, #tpu.memory_space<vmem>>, vector<1x32x64xbf16>
    %8 = vector.shape_cast %7 : vector<1x32x64xbf16> to vector<32x64xbf16>
    %cst_9 = arith.constant dense<0.000000e+00> : vector<32x64xf32>
    %9 = tpu.matmul %8, %0, %cst_9 {dimension_numbers = #tpu.dot_dimension_numbers<[1], [0], [0], [1], [0, 0, 1, 1], [], []>} : vector<32x64xbf16>, vector<64x64xbf16>, vector<32x64xf32> -> vector<32x64xf32>
    %c3 = arith.constant 3 : index
    %c0_10 = arith.constant 0 : index
    %c0_11 = arith.constant 0 : index
    %10 = vector.load %arg2[%c3, %c0_10, %c0_11] : memref<4x32x64xbf16, #tpu.memory_space<vmem>>, vector<1x32x64xbf16>
    %11 = vector.shape_cast %10 : vector<1x32x64xbf16> to vector<32x64xbf16>
    %cst_12 = arith.constant dense<0.000000e+00> : vector<32x64xf32>
    %12 = tpu.matmul %11, %0, %cst_12 {dimension_numbers = #tpu.dot_dimension_numbers<[1], [0], [0], [1], [0, 0, 1, 1], [], []>} : vector<32x64xbf16>, vector<64x64xbf16>, vector<32x64xf32> -> vector<32x64xf32>
    %13 = tpu.concatenate %3, %6, %9, %12 in 1 : vector<32x64xf32>, vector<32x64xf32>, vector<32x64xf32>, vector<32x64xf32> -> vector<32x256xf32>
    %14 = arith.truncf %13 : vector<32x256xf32> to vector<32x256xbf16>
    %c0_13 = arith.constant 0 : index
    %c0_14 = arith.constant 0 : index
    %15 = vector.load %arg3[%c0_13, %c0_14] : memref<256x64xbf16, #tpu.memory_space<vmem>>, vector<256x64xbf16>
    %cst_15 = arith.constant dense<0.000000e+00> : vector<32x64xf32>
    %16 = tpu.matmul %14, %15, %cst_15 {dimension_numbers = #tpu.dot_dimension_numbers<[1], [0], [0], [1], [0, 0, 1, 1], [], []>} : vector<32x256xbf16>, vector<256x64xbf16>, vector<32x64xf32> -> vector<32x64xf32>
    %17 = arith.mulf %16, %16 : vector<32x64xf32>
    %18 = tpu.concatenate %16, %17 in 1 : vector<32x64xf32>, vector<32x64xf32> -> vector<32x128xf32>
    %c0_16 = arith.constant 0 : index
    %c0_17 = arith.constant 0 : index
    %19 = vector.load %arg4[%c0_16, %c0_17] : memref<2x32xf32, #tpu.memory_space<vmem>>, vector<2x32xf32>
    %cst_18 = arith.constant dense<0.000000e+00> : vector<2x128xf32>
    %20 = tpu.matmul %19, %18, %cst_18 {dimension_numbers = #tpu.dot_dimension_numbers<[1], [0], [0], [1], [0, 0, 1, 1], [], []>} : vector<2x32xf32>, vector<32x128xf32>, vector<2x128xf32> -> vector<2x128xf32>
    %c0_19 = arith.constant 0 : index
    %c0_20 = arith.constant 0 : index
    %21 = vector.load %arg5[%c0_19, %c0_20] : memref<128x8xf32, #tpu.memory_space<vmem>>, vector<128x8xf32>
    %cst_21 = arith.constant dense<0.000000e+00> : vector<2x8xf32>
    %22 = tpu.matmul %20, %21, %cst_21 {dimension_numbers = #tpu.dot_dimension_numbers<[1], [0], [0], [1], [0, 0, 1, 1], [], []>} : vector<2x128xf32>, vector<128x8xf32>, vector<2x8xf32> -> vector<2x8xf32>
    %cst_22 = arith.constant 3.906250e-03 : f32
    %23 = vector.broadcast %cst_22 : f32 to vector<2x8xf32>
    %24 = arith.mulf %22, %23 : vector<2x8xf32>
    %25 = vector.extract_strided_slice %24 {offsets = [0, 0], sizes = [2, 4], strides = [1, 1]} : vector<2x8xf32> to vector<2x4xf32>
    %26 = vector.extract_strided_slice %24 {offsets = [0, 4], sizes = [2, 4], strides = [1, 1]} : vector<2x8xf32> to vector<2x4xf32>
    %27 = arith.mulf %25, %25 : vector<2x4xf32>
    %28 = arith.subf %26, %27 : vector<2x4xf32>
    %cst_23 = arith.constant 0.000000e+00 : f32
    %29 = vector.broadcast %cst_23 : f32 to vector<2x4xf32>
    %30 = arith.maximumf %28, %29 : vector<2x4xf32>
    %cst_24 = arith.constant 9.99999974E-6 : f32
    %31 = vector.broadcast %cst_24 : f32 to vector<2x4xf32>
    %32 = arith.addf %30, %31 : vector<2x4xf32>
    %33 = math.rsqrt %32 : vector<2x4xf32>
    %cst_25 = arith.constant 0.000000e+00 : f32
    %34 = vector.broadcast %cst_25 : f32 to vector<2x4xf32>
    %35 = arith.subf %34, %25 : vector<2x4xf32>
    %36 = arith.mulf %35, %33 : vector<2x4xf32>
    %37 = tpu.concatenate %33, %36 in 1 : vector<2x4xf32>, vector<2x4xf32> -> vector<2x8xf32>
    %c0_26 = arith.constant 0 : index
    %c0_27 = arith.constant 0 : index
    %38 = vector.load %arg6[%c0_26, %c0_27] : memref<8x128xf32, #tpu.memory_space<vmem>>, vector<8x128xf32>
    %cst_28 = arith.constant dense<0.000000e+00> : vector<2x128xf32>
    %39 = tpu.matmul %37, %38, %cst_28 {dimension_numbers = #tpu.dot_dimension_numbers<[1], [0], [0], [1], [0, 0, 1, 1], [], []>} : vector<2x8xf32>, vector<8x128xf32>, vector<2x128xf32> -> vector<2x128xf32>
    %c0_29 = arith.constant 0 : index
    %c0_30 = arith.constant 0 : index
    %40 = vector.load %arg7[%c0_29, %c0_30] : memref<32x2xf32, #tpu.memory_space<vmem>>, vector<32x2xf32>
    %cst_31 = arith.constant dense<0.000000e+00> : vector<32x128xf32>
    %41 = tpu.matmul %40, %39, %cst_31 {dimension_numbers = #tpu.dot_dimension_numbers<[1], [0], [0], [1], [0, 0, 1, 1], [], []>} : vector<32x2xf32>, vector<2x128xf32>, vector<32x128xf32> -> vector<32x128xf32>
    %42 = vector.extract_strided_slice %41 {offsets = [0, 0], sizes = [32, 64], strides = [1, 1]} : vector<32x128xf32> to vector<32x64xf32>
    %43 = arith.mulf %16, %42 : vector<32x64xf32>
    %44 = vector.extract_strided_slice %41 {offsets = [0, 64], sizes = [32, 64], strides = [1, 1]} : vector<32x128xf32> to vector<32x64xf32>
    %45 = arith.addf %43, %44 : vector<32x64xf32>
    %c0_32 = arith.constant 0 : index
    %c0_33 = arith.constant 0 : index
    %46 = vector.load %arg8[%c0_32, %c0_33] : memref<2x64xf32, #tpu.memory_space<vmem>>, vector<1x64xf32>
    %47 = vector.broadcast %46 : vector<1x64xf32> to vector<32x64xf32>
    %48 = arith.addf %45, %47 : vector<32x64xf32>
    %cst_34 = arith.constant 0.000000e+00 : f32
    %49 = vector.broadcast %cst_34 : f32 to vector<32x64xf32>
    %50 = arith.cmpf ogt, %48, %49 : vector<32x64xf32>
    %c1_35 = arith.constant 1 : index
    %c0_36 = arith.constant 0 : index
    %51 = vector.load %arg8[%c1_35, %c0_36] : memref<2x64xf32, #tpu.memory_space<vmem>>, vector<1x64xf32>
    %52 = vector.broadcast %51 : vector<1x64xf32> to vector<32x64xf32>
    %53 = arith.mulf %52, %48 : vector<32x64xf32>
    %54 = arith.select %50, %48, %53 : vector<32x64xi1>, vector<32x64xf32>
    %55 = arith.truncf %54 : vector<32x64xf32> to vector<32x64xbf16>
    %c0_37 = arith.constant 0 : index
    %c0_38 = arith.constant 0 : index
    %c0_39 = arith.constant 0 : index
    %56 = vector.load %arg9[%c0_37, %c0_38, %c0_39] : memref<4x16x32xbf16, #tpu.memory_space<vmem>>, vector<1x16x32xbf16>
    %57 = vector.shape_cast %56 : vector<1x16x32xbf16> to vector<16x32xbf16>
    %cst_40 = arith.constant dense<0.000000e+00> : vector<16x64xf32>
    %58 = tpu.matmul %57, %55, %cst_40 {dimension_numbers = #tpu.dot_dimension_numbers<[1], [0], [0], [1], [0, 0, 1, 1], [], []>} : vector<16x32xbf16>, vector<32x64xbf16>, vector<16x64xf32> -> vector<16x64xf32>
    %c1_41 = arith.constant 1 : index
    %c0_42 = arith.constant 0 : index
    %c0_43 = arith.constant 0 : index
    %59 = vector.load %arg9[%c1_41, %c0_42, %c0_43] : memref<4x16x32xbf16, #tpu.memory_space<vmem>>, vector<1x16x32xbf16>
    %60 = vector.shape_cast %59 : vector<1x16x32xbf16> to vector<16x32xbf16>
    %cst_44 = arith.constant dense<0.000000e+00> : vector<16x64xf32>
    %61 = tpu.matmul %60, %55, %cst_44 {dimension_numbers = #tpu.dot_dimension_numbers<[1], [0], [0], [1], [0, 0, 1, 1], [], []>} : vector<16x32xbf16>, vector<32x64xbf16>, vector<16x64xf32> -> vector<16x64xf32>
    %c2_45 = arith.constant 2 : index
    %c0_46 = arith.constant 0 : index
    %c0_47 = arith.constant 0 : index
    %62 = vector.load %arg9[%c2_45, %c0_46, %c0_47] : memref<4x16x32xbf16, #tpu.memory_space<vmem>>, vector<1x16x32xbf16>
    %63 = vector.shape_cast %62 : vector<1x16x32xbf16> to vector<16x32xbf16>
    %cst_48 = arith.constant dense<0.000000e+00> : vector<16x64xf32>
    %64 = tpu.matmul %63, %55, %cst_48 {dimension_numbers = #tpu.dot_dimension_numbers<[1], [0], [0], [1], [0, 0, 1, 1], [], []>} : vector<16x32xbf16>, vector<32x64xbf16>, vector<16x64xf32> -> vector<16x64xf32>
    %c3_49 = arith.constant 3 : index
    %c0_50 = arith.constant 0 : index
    %c0_51 = arith.constant 0 : index
    %65 = vector.load %arg9[%c3_49, %c0_50, %c0_51] : memref<4x16x32xbf16, #tpu.memory_space<vmem>>, vector<1x16x32xbf16>
    %66 = vector.shape_cast %65 : vector<1x16x32xbf16> to vector<16x32xbf16>
    %cst_52 = arith.constant dense<0.000000e+00> : vector<16x64xf32>
    %67 = tpu.matmul %66, %55, %cst_52 {dimension_numbers = #tpu.dot_dimension_numbers<[1], [0], [0], [1], [0, 0, 1, 1], [], []>} : vector<16x32xbf16>, vector<32x64xbf16>, vector<16x64xf32> -> vector<16x64xf32>
    %68 = tpu.concatenate %58, %61, %64, %67 in 1 : vector<16x64xf32>, vector<16x64xf32>, vector<16x64xf32>, vector<16x64xf32> -> vector<16x256xf32>
    %69 = arith.truncf %68 : vector<16x256xf32> to vector<16x256xbf16>
    %c0_53 = arith.constant 0 : index
    %c0_54 = arith.constant 0 : index
    %70 = vector.load %arg10[%c0_53, %c0_54] : memref<256x64xbf16, #tpu.memory_space<vmem>>, vector<256x64xbf16>
    %cst_55 = arith.constant dense<0.000000e+00> : vector<16x64xf32>
    %71 = tpu.matmul %69, %70, %cst_55 {dimension_numbers = #tpu.dot_dimension_numbers<[1], [0], [0], [1], [0, 0, 1, 1], [], []>} : vector<16x256xbf16>, vector<256x64xbf16>, vector<16x64xf32> -> vector<16x64xf32>
    %72 = arith.mulf %71, %71 : vector<16x64xf32>
    %73 = tpu.concatenate %71, %72 in 1 : vector<16x64xf32>, vector<16x64xf32> -> vector<16x128xf32>
    %c0_56 = arith.constant 0 : index
    %c0_57 = arith.constant 0 : index
    %74 = vector.load %arg11[%c0_56, %c0_57] : memref<2x16xf32, #tpu.memory_space<vmem>>, vector<2x16xf32>
    %cst_58 = arith.constant dense<0.000000e+00> : vector<2x128xf32>
    %75 = tpu.matmul %74, %73, %cst_58 {dimension_numbers = #tpu.dot_dimension_numbers<[1], [0], [0], [1], [0, 0, 1, 1], [], []>} : vector<2x16xf32>, vector<16x128xf32>, vector<2x128xf32> -> vector<2x128xf32>
    %c0_59 = arith.constant 0 : index
    %c0_60 = arith.constant 0 : index
    %76 = vector.load %arg12[%c0_59, %c0_60] : memref<128x16xf32, #tpu.memory_space<vmem>>, vector<128x16xf32>
    %cst_61 = arith.constant dense<0.000000e+00> : vector<2x16xf32>
    %77 = tpu.matmul %75, %76, %cst_61 {dimension_numbers = #tpu.dot_dimension_numbers<[1], [0], [0], [1], [0, 0, 1, 1], [], []>} : vector<2x128xf32>, vector<128x16xf32>, vector<2x16xf32> -> vector<2x16xf32>
    %cst_62 = arith.constant 1.562500e-02 : f32
    %78 = vector.broadcast %cst_62 : f32 to vector<2x16xf32>
    %79 = arith.mulf %77, %78 : vector<2x16xf32>
    %80 = vector.extract_strided_slice %79 {offsets = [0, 0], sizes = [2, 8], strides = [1, 1]} : vector<2x16xf32> to vector<2x8xf32>
    %81 = vector.extract_strided_slice %79 {offsets = [0, 8], sizes = [2, 8], strides = [1, 1]} : vector<2x16xf32> to vector<2x8xf32>
    %82 = arith.mulf %80, %80 : vector<2x8xf32>
    %83 = arith.subf %81, %82 : vector<2x8xf32>
    %cst_63 = arith.constant 0.000000e+00 : f32
    %84 = vector.broadcast %cst_63 : f32 to vector<2x8xf32>
    %85 = arith.maximumf %83, %84 : vector<2x8xf32>
    %cst_64 = arith.constant 9.99999974E-6 : f32
    %86 = vector.broadcast %cst_64 : f32 to vector<2x8xf32>
    %87 = arith.addf %85, %86 : vector<2x8xf32>
    %88 = math.rsqrt %87 : vector<2x8xf32>
    %cst_65 = arith.constant 0.000000e+00 : f32
    %89 = vector.broadcast %cst_65 : f32 to vector<2x8xf32>
    %90 = arith.subf %89, %80 : vector<2x8xf32>
    %91 = arith.mulf %90, %88 : vector<2x8xf32>
    %92 = tpu.concatenate %88, %91 in 1 : vector<2x8xf32>, vector<2x8xf32> -> vector<2x16xf32>
    %c0_66 = arith.constant 0 : index
    %c0_67 = arith.constant 0 : index
    %93 = vector.load %arg13[%c0_66, %c0_67] : memref<16x128xf32, #tpu.memory_space<vmem>>, vector<16x128xf32>
    %cst_68 = arith.constant dense<0.000000e+00> : vector<2x128xf32>
    %94 = tpu.matmul %92, %93, %cst_68 {dimension_numbers = #tpu.dot_dimension_numbers<[1], [0], [0], [1], [0, 0, 1, 1], [], []>} : vector<2x16xf32>, vector<16x128xf32>, vector<2x128xf32> -> vector<2x128xf32>
    %c0_69 = arith.constant 0 : index
    %c0_70 = arith.constant 0 : index
    %95 = vector.load %arg14[%c0_69, %c0_70] : memref<16x2xf32, #tpu.memory_space<vmem>>, vector<16x2xf32>
    %cst_71 = arith.constant dense<0.000000e+00> : vector<16x128xf32>
    %96 = tpu.matmul %95, %94, %cst_71 {dimension_numbers = #tpu.dot_dimension_numbers<[1], [0], [0], [1], [0, 0, 1, 1], [], []>} : vector<16x2xf32>, vector<2x128xf32>, vector<16x128xf32> -> vector<16x128xf32>
    %97 = vector.extract_strided_slice %96 {offsets = [0, 0], sizes = [16, 64], strides = [1, 1]} : vector<16x128xf32> to vector<16x64xf32>
    %98 = arith.mulf %71, %97 : vector<16x64xf32>
    %99 = vector.extract_strided_slice %96 {offsets = [0, 64], sizes = [16, 64], strides = [1, 1]} : vector<16x128xf32> to vector<16x64xf32>
    %100 = arith.addf %98, %99 : vector<16x64xf32>
    %c0_72 = arith.constant 0 : index
    %c0_73 = arith.constant 0 : index
    %101 = vector.load %arg15[%c0_72, %c0_73] : memref<2x64xf32, #tpu.memory_space<vmem>>, vector<1x64xf32>
    %102 = vector.broadcast %101 : vector<1x64xf32> to vector<16x64xf32>
    %103 = arith.addf %100, %102 : vector<16x64xf32>
    %cst_74 = arith.constant 0.000000e+00 : f32
    %104 = vector.broadcast %cst_74 : f32 to vector<16x64xf32>
    %105 = arith.cmpf ogt, %103, %104 : vector<16x64xf32>
    %c1_75 = arith.constant 1 : index
    %c0_76 = arith.constant 0 : index
    %106 = vector.load %arg15[%c1_75, %c0_76] : memref<2x64xf32, #tpu.memory_space<vmem>>, vector<1x64xf32>
    %107 = vector.broadcast %106 : vector<1x64xf32> to vector<16x64xf32>
    %108 = arith.mulf %107, %103 : vector<16x64xf32>
    %109 = arith.select %105, %103, %108 : vector<16x64xi1>, vector<16x64xf32>
    %110 = arith.truncf %109 : vector<16x64xf32> to vector<16x64xbf16>
    %c0_77 = arith.constant 0 : index
    %c0_78 = arith.constant 0 : index
    %c0_79 = arith.constant 0 : index
    %111 = vector.load %arg16[%c0_77, %c0_78, %c0_79] : memref<4x8x16xbf16, #tpu.memory_space<vmem>>, vector<1x8x16xbf16>
    %112 = vector.shape_cast %111 : vector<1x8x16xbf16> to vector<8x16xbf16>
    %cst_80 = arith.constant dense<0.000000e+00> : vector<8x64xf32>
    %113 = tpu.matmul %112, %110, %cst_80 {dimension_numbers = #tpu.dot_dimension_numbers<[1], [0], [0], [1], [0, 0, 1, 1], [], []>} : vector<8x16xbf16>, vector<16x64xbf16>, vector<8x64xf32> -> vector<8x64xf32>
    %c1_81 = arith.constant 1 : index
    %c0_82 = arith.constant 0 : index
    %c0_83 = arith.constant 0 : index
    %114 = vector.load %arg16[%c1_81, %c0_82, %c0_83] : memref<4x8x16xbf16, #tpu.memory_space<vmem>>, vector<1x8x16xbf16>
    %115 = vector.shape_cast %114 : vector<1x8x16xbf16> to vector<8x16xbf16>
    %cst_84 = arith.constant dense<0.000000e+00> : vector<8x64xf32>
    %116 = tpu.matmul %115, %110, %cst_84 {dimension_numbers = #tpu.dot_dimension_numbers<[1], [0], [0], [1], [0, 0, 1, 1], [], []>} : vector<8x16xbf16>, vector<16x64xbf16>, vector<8x64xf32> -> vector<8x64xf32>
    %c2_85 = arith.constant 2 : index
    %c0_86 = arith.constant 0 : index
    %c0_87 = arith.constant 0 : index
    %117 = vector.load %arg16[%c2_85, %c0_86, %c0_87] : memref<4x8x16xbf16, #tpu.memory_space<vmem>>, vector<1x8x16xbf16>
    %118 = vector.shape_cast %117 : vector<1x8x16xbf16> to vector<8x16xbf16>
    %cst_88 = arith.constant dense<0.000000e+00> : vector<8x64xf32>
    %119 = tpu.matmul %118, %110, %cst_88 {dimension_numbers = #tpu.dot_dimension_numbers<[1], [0], [0], [1], [0, 0, 1, 1], [], []>} : vector<8x16xbf16>, vector<16x64xbf16>, vector<8x64xf32> -> vector<8x64xf32>
    %c3_89 = arith.constant 3 : index
    %c0_90 = arith.constant 0 : index
    %c0_91 = arith.constant 0 : index
    %120 = vector.load %arg16[%c3_89, %c0_90, %c0_91] : memref<4x8x16xbf16, #tpu.memory_space<vmem>>, vector<1x8x16xbf16>
    %121 = vector.shape_cast %120 : vector<1x8x16xbf16> to vector<8x16xbf16>
    %cst_92 = arith.constant dense<0.000000e+00> : vector<8x64xf32>
    %122 = tpu.matmul %121, %110, %cst_92 {dimension_numbers = #tpu.dot_dimension_numbers<[1], [0], [0], [1], [0, 0, 1, 1], [], []>} : vector<8x16xbf16>, vector<16x64xbf16>, vector<8x64xf32> -> vector<8x64xf32>
    %123 = tpu.concatenate %113, %116, %119, %122 in 1 : vector<8x64xf32>, vector<8x64xf32>, vector<8x64xf32>, vector<8x64xf32> -> vector<8x256xf32>
    %124 = arith.truncf %123 : vector<8x256xf32> to vector<8x256xbf16>
    %c0_93 = arith.constant 0 : index
    %c0_94 = arith.constant 0 : index
    %125 = vector.load %arg17[%c0_93, %c0_94] : memref<256x64xbf16, #tpu.memory_space<vmem>>, vector<256x64xbf16>
    %cst_95 = arith.constant dense<0.000000e+00> : vector<8x64xf32>
    %126 = tpu.matmul %124, %125, %cst_95 {dimension_numbers = #tpu.dot_dimension_numbers<[1], [0], [0], [1], [0, 0, 1, 1], [], []>} : vector<8x256xbf16>, vector<256x64xbf16>, vector<8x64xf32> -> vector<8x64xf32>
    %127 = arith.mulf %126, %126 : vector<8x64xf32>
    %128 = tpu.concatenate %126, %127 in 1 : vector<8x64xf32>, vector<8x64xf32> -> vector<8x128xf32>
    %c0_96 = arith.constant 0 : index
    %c0_97 = arith.constant 0 : index
    %129 = vector.load %arg18[%c0_96, %c0_97] : memref<2x8xf32, #tpu.memory_space<vmem>>, vector<2x8xf32>
    %cst_98 = arith.constant dense<0.000000e+00> : vector<2x128xf32>
    %130 = tpu.matmul %129, %128, %cst_98 {dimension_numbers = #tpu.dot_dimension_numbers<[1], [0], [0], [1], [0, 0, 1, 1], [], []>} : vector<2x8xf32>, vector<8x128xf32>, vector<2x128xf32> -> vector<2x128xf32>
    %c0_99 = arith.constant 0 : index
    %c0_100 = arith.constant 0 : index
    %131 = vector.load %arg19[%c0_99, %c0_100] : memref<128x32xf32, #tpu.memory_space<vmem>>, vector<128x32xf32>
    %cst_101 = arith.constant dense<0.000000e+00> : vector<2x32xf32>
    %132 = tpu.matmul %130, %131, %cst_101 {dimension_numbers = #tpu.dot_dimension_numbers<[1], [0], [0], [1], [0, 0, 1, 1], [], []>} : vector<2x128xf32>, vector<128x32xf32>, vector<2x32xf32> -> vector<2x32xf32>
    %cst_102 = arith.constant 6.250000e-02 : f32
    %133 = vector.broadcast %cst_102 : f32 to vector<2x32xf32>
    %134 = arith.mulf %132, %133 : vector<2x32xf32>
    %135 = vector.extract_strided_slice %134 {offsets = [0, 0], sizes = [2, 16], strides = [1, 1]} : vector<2x32xf32> to vector<2x16xf32>
    %136 = vector.extract_strided_slice %134 {offsets = [0, 16], sizes = [2, 16], strides = [1, 1]} : vector<2x32xf32> to vector<2x16xf32>
    %137 = arith.mulf %135, %135 : vector<2x16xf32>
    %138 = arith.subf %136, %137 : vector<2x16xf32>
    %cst_103 = arith.constant 0.000000e+00 : f32
    %139 = vector.broadcast %cst_103 : f32 to vector<2x16xf32>
    %140 = arith.maximumf %138, %139 : vector<2x16xf32>
    %cst_104 = arith.constant 9.99999974E-6 : f32
    %141 = vector.broadcast %cst_104 : f32 to vector<2x16xf32>
    %142 = arith.addf %140, %141 : vector<2x16xf32>
    %143 = math.rsqrt %142 : vector<2x16xf32>
    %cst_105 = arith.constant 0.000000e+00 : f32
    %144 = vector.broadcast %cst_105 : f32 to vector<2x16xf32>
    %145 = arith.subf %144, %135 : vector<2x16xf32>
    %146 = arith.mulf %145, %143 : vector<2x16xf32>
    %147 = tpu.concatenate %143, %146 in 1 : vector<2x16xf32>, vector<2x16xf32> -> vector<2x32xf32>
    %c0_106 = arith.constant 0 : index
    %c0_107 = arith.constant 0 : index
    %148 = vector.load %arg20[%c0_106, %c0_107] : memref<32x128xf32, #tpu.memory_space<vmem>>, vector<32x128xf32>
    %cst_108 = arith.constant dense<0.000000e+00> : vector<2x128xf32>
    %149 = tpu.matmul %147, %148, %cst_108 {dimension_numbers = #tpu.dot_dimension_numbers<[1], [0], [0], [1], [0, 0, 1, 1], [], []>} : vector<2x32xf32>, vector<32x128xf32>, vector<2x128xf32> -> vector<2x128xf32>
    %c0_109 = arith.constant 0 : index
    %c0_110 = arith.constant 0 : index
    %150 = vector.load %arg21[%c0_109, %c0_110] : memref<8x2xf32, #tpu.memory_space<vmem>>, vector<8x2xf32>
    %cst_111 = arith.constant dense<0.000000e+00> : vector<8x128xf32>
    %151 = tpu.matmul %150, %149, %cst_111 {dimension_numbers = #tpu.dot_dimension_numbers<[1], [0], [0], [1], [0, 0, 1, 1], [], []>} : vector<8x2xf32>, vector<2x128xf32>, vector<8x128xf32> -> vector<8x128xf32>
    %152 = vector.extract_strided_slice %151 {offsets = [0, 0], sizes = [8, 64], strides = [1, 1]} : vector<8x128xf32> to vector<8x64xf32>
    %153 = arith.mulf %126, %152 : vector<8x64xf32>
    %154 = vector.extract_strided_slice %151 {offsets = [0, 64], sizes = [8, 64], strides = [1, 1]} : vector<8x128xf32> to vector<8x64xf32>
    %155 = arith.addf %153, %154 : vector<8x64xf32>
    %c0_112 = arith.constant 0 : index
    %c0_113 = arith.constant 0 : index
    %156 = vector.load %arg22[%c0_112, %c0_113] : memref<2x64xf32, #tpu.memory_space<vmem>>, vector<1x64xf32>
    %157 = vector.broadcast %156 : vector<1x64xf32> to vector<8x64xf32>
    %158 = arith.addf %155, %157 : vector<8x64xf32>
    %cst_114 = arith.constant 0.000000e+00 : f32
    %159 = vector.broadcast %cst_114 : f32 to vector<8x64xf32>
    %160 = arith.cmpf ogt, %158, %159 : vector<8x64xf32>
    %c1_115 = arith.constant 1 : index
    %c0_116 = arith.constant 0 : index
    %161 = vector.load %arg22[%c1_115, %c0_116] : memref<2x64xf32, #tpu.memory_space<vmem>>, vector<1x64xf32>
    %162 = vector.broadcast %161 : vector<1x64xf32> to vector<8x64xf32>
    %163 = arith.mulf %162, %158 : vector<8x64xf32>
    %164 = arith.select %160, %158, %163 : vector<8x64xi1>, vector<8x64xf32>
    %165 = arith.truncf %164 : vector<8x64xf32> to vector<8x64xbf16>
    %c0_117 = arith.constant 0 : index
    %c0_118 = arith.constant 0 : index
    %c0_119 = arith.constant 0 : index
    %166 = vector.load %arg23[%c0_117, %c0_118, %c0_119] : memref<4x4x8xbf16, #tpu.memory_space<vmem>>, vector<1x4x8xbf16>
    %167 = vector.shape_cast %166 : vector<1x4x8xbf16> to vector<4x8xbf16>
    %cst_120 = arith.constant dense<0.000000e+00> : vector<4x64xf32>
    %168 = tpu.matmul %167, %165, %cst_120 {dimension_numbers = #tpu.dot_dimension_numbers<[1], [0], [0], [1], [0, 0, 1, 1], [], []>} : vector<4x8xbf16>, vector<8x64xbf16>, vector<4x64xf32> -> vector<4x64xf32>
    %c1_121 = arith.constant 1 : index
    %c0_122 = arith.constant 0 : index
    %c0_123 = arith.constant 0 : index
    %169 = vector.load %arg23[%c1_121, %c0_122, %c0_123] : memref<4x4x8xbf16, #tpu.memory_space<vmem>>, vector<1x4x8xbf16>
    %170 = vector.shape_cast %169 : vector<1x4x8xbf16> to vector<4x8xbf16>
    %cst_124 = arith.constant dense<0.000000e+00> : vector<4x64xf32>
    %171 = tpu.matmul %170, %165, %cst_124 {dimension_numbers = #tpu.dot_dimension_numbers<[1], [0], [0], [1], [0, 0, 1, 1], [], []>} : vector<4x8xbf16>, vector<8x64xbf16>, vector<4x64xf32> -> vector<4x64xf32>
    %c2_125 = arith.constant 2 : index
    %c0_126 = arith.constant 0 : index
    %c0_127 = arith.constant 0 : index
    %172 = vector.load %arg23[%c2_125, %c0_126, %c0_127] : memref<4x4x8xbf16, #tpu.memory_space<vmem>>, vector<1x4x8xbf16>
    %173 = vector.shape_cast %172 : vector<1x4x8xbf16> to vector<4x8xbf16>
    %cst_128 = arith.constant dense<0.000000e+00> : vector<4x64xf32>
    %174 = tpu.matmul %173, %165, %cst_128 {dimension_numbers = #tpu.dot_dimension_numbers<[1], [0], [0], [1], [0, 0, 1, 1], [], []>} : vector<4x8xbf16>, vector<8x64xbf16>, vector<4x64xf32> -> vector<4x64xf32>
    %c3_129 = arith.constant 3 : index
    %c0_130 = arith.constant 0 : index
    %c0_131 = arith.constant 0 : index
    %175 = vector.load %arg23[%c3_129, %c0_130, %c0_131] : memref<4x4x8xbf16, #tpu.memory_space<vmem>>, vector<1x4x8xbf16>
    %176 = vector.shape_cast %175 : vector<1x4x8xbf16> to vector<4x8xbf16>
    %cst_132 = arith.constant dense<0.000000e+00> : vector<4x64xf32>
    %177 = tpu.matmul %176, %165, %cst_132 {dimension_numbers = #tpu.dot_dimension_numbers<[1], [0], [0], [1], [0, 0, 1, 1], [], []>} : vector<4x8xbf16>, vector<8x64xbf16>, vector<4x64xf32> -> vector<4x64xf32>
    %178 = tpu.concatenate %168, %171, %174, %177 in 1 : vector<4x64xf32>, vector<4x64xf32>, vector<4x64xf32>, vector<4x64xf32> -> vector<4x256xf32>
    %179 = arith.truncf %178 : vector<4x256xf32> to vector<4x256xbf16>
    %c0_133 = arith.constant 0 : index
    %c0_134 = arith.constant 0 : index
    %180 = vector.load %arg24[%c0_133, %c0_134] : memref<256x64xbf16, #tpu.memory_space<vmem>>, vector<256x64xbf16>
    %cst_135 = arith.constant dense<0.000000e+00> : vector<4x64xf32>
    %181 = tpu.matmul %179, %180, %cst_135 {dimension_numbers = #tpu.dot_dimension_numbers<[1], [0], [0], [1], [0, 0, 1, 1], [], []>} : vector<4x256xbf16>, vector<256x64xbf16>, vector<4x64xf32> -> vector<4x64xf32>
    %182 = arith.mulf %181, %181 : vector<4x64xf32>
    %183 = tpu.concatenate %181, %182 in 1 : vector<4x64xf32>, vector<4x64xf32> -> vector<4x128xf32>
    %c0_136 = arith.constant 0 : index
    %c0_137 = arith.constant 0 : index
    %184 = vector.load %arg25[%c0_136, %c0_137] : memref<2x4xf32, #tpu.memory_space<vmem>>, vector<2x4xf32>
    %cst_138 = arith.constant dense<0.000000e+00> : vector<2x128xf32>
    %185 = tpu.matmul %184, %183, %cst_138 {dimension_numbers = #tpu.dot_dimension_numbers<[1], [0], [0], [1], [0, 0, 1, 1], [], []>} : vector<2x4xf32>, vector<4x128xf32>, vector<2x128xf32> -> vector<2x128xf32>
    %c0_139 = arith.constant 0 : index
    %c0_140 = arith.constant 0 : index
    %186 = vector.load %arg26[%c0_139, %c0_140] : memref<128x64xf32, #tpu.memory_space<vmem>>, vector<128x64xf32>
    %cst_141 = arith.constant dense<0.000000e+00> : vector<2x64xf32>
    %187 = tpu.matmul %185, %186, %cst_141 {dimension_numbers = #tpu.dot_dimension_numbers<[1], [0], [0], [1], [0, 0, 1, 1], [], []>} : vector<2x128xf32>, vector<128x64xf32>, vector<2x64xf32> -> vector<2x64xf32>
    %cst_142 = arith.constant 2.500000e-01 : f32
    %188 = vector.broadcast %cst_142 : f32 to vector<2x64xf32>
    %189 = arith.mulf %187, %188 : vector<2x64xf32>
    %190 = vector.extract_strided_slice %189 {offsets = [0, 0], sizes = [2, 32], strides = [1, 1]} : vector<2x64xf32> to vector<2x32xf32>
    %191 = vector.extract_strided_slice %189 {offsets = [0, 32], sizes = [2, 32], strides = [1, 1]} : vector<2x64xf32> to vector<2x32xf32>
    %192 = arith.mulf %190, %190 : vector<2x32xf32>
    %193 = arith.subf %191, %192 : vector<2x32xf32>
    %cst_143 = arith.constant 0.000000e+00 : f32
    %194 = vector.broadcast %cst_143 : f32 to vector<2x32xf32>
    %195 = arith.maximumf %193, %194 : vector<2x32xf32>
    %cst_144 = arith.constant 9.99999974E-6 : f32
    %196 = vector.broadcast %cst_144 : f32 to vector<2x32xf32>
    %197 = arith.addf %195, %196 : vector<2x32xf32>
    %198 = math.rsqrt %197 : vector<2x32xf32>
    %cst_145 = arith.constant 0.000000e+00 : f32
    %199 = vector.broadcast %cst_145 : f32 to vector<2x32xf32>
    %200 = arith.subf %199, %190 : vector<2x32xf32>
    %201 = arith.mulf %200, %198 : vector<2x32xf32>
    %202 = tpu.concatenate %198, %201 in 1 : vector<2x32xf32>, vector<2x32xf32> -> vector<2x64xf32>
    %c0_146 = arith.constant 0 : index
    %c0_147 = arith.constant 0 : index
    %203 = vector.load %arg27[%c0_146, %c0_147] : memref<64x128xf32, #tpu.memory_space<vmem>>, vector<64x128xf32>
    %cst_148 = arith.constant dense<0.000000e+00> : vector<2x128xf32>
    %204 = tpu.matmul %202, %203, %cst_148 {dimension_numbers = #tpu.dot_dimension_numbers<[1], [0], [0], [1], [0, 0, 1, 1], [], []>} : vector<2x64xf32>, vector<64x128xf32>, vector<2x128xf32> -> vector<2x128xf32>
    %c0_149 = arith.constant 0 : index
    %c0_150 = arith.constant 0 : index
    %205 = vector.load %arg28[%c0_149, %c0_150] : memref<4x2xf32, #tpu.memory_space<vmem>>, vector<4x2xf32>
    %cst_151 = arith.constant dense<0.000000e+00> : vector<4x128xf32>
    %206 = tpu.matmul %205, %204, %cst_151 {dimension_numbers = #tpu.dot_dimension_numbers<[1], [0], [0], [1], [0, 0, 1, 1], [], []>} : vector<4x2xf32>, vector<2x128xf32>, vector<4x128xf32> -> vector<4x128xf32>
    %207 = vector.extract_strided_slice %206 {offsets = [0, 0], sizes = [4, 64], strides = [1, 1]} : vector<4x128xf32> to vector<4x64xf32>
    %208 = arith.mulf %181, %207 : vector<4x64xf32>
    %209 = vector.extract_strided_slice %206 {offsets = [0, 64], sizes = [4, 64], strides = [1, 1]} : vector<4x128xf32> to vector<4x64xf32>
    %210 = arith.addf %208, %209 : vector<4x64xf32>
    %c0_152 = arith.constant 0 : index
    %c0_153 = arith.constant 0 : index
    %211 = vector.load %arg29[%c0_152, %c0_153] : memref<2x64xf32, #tpu.memory_space<vmem>>, vector<1x64xf32>
    %212 = vector.broadcast %211 : vector<1x64xf32> to vector<4x64xf32>
    %213 = arith.addf %210, %212 : vector<4x64xf32>
    %cst_154 = arith.constant 0.000000e+00 : f32
    %214 = vector.broadcast %cst_154 : f32 to vector<4x64xf32>
    %215 = arith.cmpf ogt, %213, %214 : vector<4x64xf32>
    %c1_155 = arith.constant 1 : index
    %c0_156 = arith.constant 0 : index
    %216 = vector.load %arg29[%c1_155, %c0_156] : memref<2x64xf32, #tpu.memory_space<vmem>>, vector<1x64xf32>
    %217 = vector.broadcast %216 : vector<1x64xf32> to vector<4x64xf32>
    %218 = arith.mulf %217, %213 : vector<4x64xf32>
    %219 = arith.select %215, %213, %218 : vector<4x64xi1>, vector<4x64xf32>
    %220 = vector.extract_strided_slice %219 {offsets = [0, 0], sizes = [4, 32], strides = [1, 1]} : vector<4x64xf32> to vector<4x32xf32>
    %221 = vector.extract_strided_slice %219 {offsets = [0, 32], sizes = [4, 32], strides = [1, 1]} : vector<4x64xf32> to vector<4x32xf32>
    %222 = arith.maximumf %220, %221 : vector<4x32xf32>
    %223 = vector.extract_strided_slice %222 {offsets = [0, 0], sizes = [2, 32], strides = [1, 1]} : vector<4x32xf32> to vector<2x32xf32>
    %cst_157 = arith.constant dense<0xFF800000> : vector<32xf32>
    %224 = vector.multi_reduction <maximumf>, %223, %cst_157 [0] : vector<2x32xf32> to vector<32xf32>
    %225 = vector.shape_cast %224 : vector<32xf32> to vector<1x32xf32>
    %226 = vector.extract_strided_slice %222 {offsets = [2, 0], sizes = [2, 32], strides = [1, 1]} : vector<4x32xf32> to vector<2x32xf32>
    %cst_158 = arith.constant dense<0xFF800000> : vector<32xf32>
    %227 = vector.multi_reduction <maximumf>, %226, %cst_158 [0] : vector<2x32xf32> to vector<32xf32>
    %228 = vector.shape_cast %227 : vector<32xf32> to vector<1x32xf32>
    %229 = tpu.concatenate %225, %228 in 0 : vector<1x32xf32>, vector<1x32xf32> -> vector<2x32xf32>
    %c0_159 = arith.constant 0 : index
    %c0_160 = arith.constant 0 : index
    %230 = vector.load %arg30[%c0_159, %c0_160] : memref<32x16xf32, #tpu.memory_space<vmem>>, vector<32x16xf32>
    %cst_161 = arith.constant dense<0.000000e+00> : vector<2x16xf32>
    %231 = tpu.matmul %229, %230, %cst_161 {dimension_numbers = #tpu.dot_dimension_numbers<[1], [0], [0], [1], [0, 0, 1, 1], [], []>} : vector<2x32xf32>, vector<32x16xf32>, vector<2x16xf32> -> vector<2x16xf32>
    %c0_162 = arith.constant 0 : index
    %c0_163 = arith.constant 0 : index
    %232 = vector.load %arg31[%c0_162, %c0_163] : memref<1x16xf32, #tpu.memory_space<vmem>>, vector<1x16xf32>
    %233 = vector.broadcast %232 : vector<1x16xf32> to vector<2x16xf32>
    %234 = arith.addf %231, %233 : vector<2x16xf32>
    %cst_164 = arith.constant 0.000000e+00 : f32
    %235 = vector.broadcast %cst_164 : f32 to vector<2x16xf32>
    %236 = arith.cmpf ogt, %234, %235 : vector<2x16xf32>
    %c0_165 = arith.constant 0 : index
    %c0_166 = arith.constant 0 : index
    %237 = vector.load %arg32[%c0_165, %c0_166] : memref<1x16xf32, #tpu.memory_space<vmem>>, vector<1x16xf32>
    %238 = vector.broadcast %237 : vector<1x16xf32> to vector<2x16xf32>
    %239 = arith.mulf %238, %234 : vector<2x16xf32>
    %240 = arith.select %236, %234, %239 : vector<2x16xi1>, vector<2x16xf32>
    %c0_167 = arith.constant 0 : index
    %c0_168 = arith.constant 0 : index
    %241 = vector.load %arg33[%c0_167, %c0_168] : memref<16x1xf32, #tpu.memory_space<vmem>>, vector<16x1xf32>
    %cst_169 = arith.constant dense<0.000000e+00> : vector<2x1xf32>
    %242 = tpu.matmul %240, %241, %cst_169 {dimension_numbers = #tpu.dot_dimension_numbers<[1], [0], [0], [1], [0, 0, 1, 1], [], []>} : vector<2x16xf32>, vector<16x1xf32>, vector<2x1xf32> -> vector<2x1xf32>
    %c0_170 = arith.constant 0 : index
    %c0_171 = arith.constant 0 : index
    %243 = vector.load %arg34[%c0_170, %c0_171] : memref<1x1xf32, #tpu.memory_space<vmem>>, vector<1x1xf32>
    %244 = vector.broadcast %243 : vector<1x1xf32> to vector<2x1xf32>
    %245 = arith.addf %242, %244 : vector<2x1xf32>
    %c0_172 = arith.constant 0 : index
    %c0_173 = arith.constant 0 : index
    %246 = vector.load %arg35[%c0_172, %c0_173] : memref<1x1xf32, #tpu.memory_space<vmem>>, vector<1x1xf32>
    %247 = vector.broadcast %246 : vector<1x1xf32> to vector<2x1xf32>
    %248 = arith.mulf %247, %245 : vector<2x1xf32>
    %249 = arith.negf %248 : vector<2x1xf32>
    %250 = math.exp %249 : vector<2x1xf32>
    %cst_174 = arith.constant 1.000000e+00 : f32
    %251 = vector.broadcast %cst_174 : f32 to vector<2x1xf32>
    %252 = arith.addf %251, %250 : vector<2x1xf32>
    %253 = arith.divf %251, %252 : vector<2x1xf32>
    %c0_175 = arith.constant 0 : index
    %c0_176 = arith.constant 0 : index
    %c0_177 = arith.constant 0 : index
    %254 = vector.load %arg36[%c0_175, %c0_176, %c0_177] : memref<1x2x1xf32, #tpu.memory_space<vmem>>, vector<1x2x1xf32>
    %255 = vector.shape_cast %254 : vector<1x2x1xf32> to vector<2x1xf32>
    %256 = vector.shape_cast %253 : vector<2x1xf32> to vector<1x2x1xf32>
    tpu.vector_store %arg36[%c0_175, %c0_176, %c0_177], %256 {strides = array<i32>} : memref<1x2x1xf32, #tpu.memory_space<vmem>>, vector<1x2x1xf32>,
    return
  }
  func.func @transform_0(%arg0: i32) -> (i32, i32) {
    %c0_i32 = arith.constant 0 : i32
    %c0_i32_0 = arith.constant 0 : i32
    return %arg0, %c0_i32 : i32, i32
  }
  func.func @transform_1(%arg0: i32) -> (i32, i32, i32) {
    %c0_i32 = arith.constant 0 : i32
    %c0_i32_0 = arith.constant 0 : i32
    %c0_i32_1 = arith.constant 0 : i32
    %c0_i32_2 = arith.constant 0 : i32
    return %c0_i32, %c0_i32_0, %c0_i32_1 : i32, i32, i32
  }
  func.func @transform_2(%arg0: i32) -> (i32, i32) {
    %c0_i32 = arith.constant 0 : i32
    %c0_i32_0 = arith.constant 0 : i32
    %c0_i32_1 = arith.constant 0 : i32
    return %c0_i32, %c0_i32_0 : i32, i32
  }
  func.func @transform_3(%arg0: i32) -> (i32, i32) {
    %c0_i32 = arith.constant 0 : i32
    %c0_i32_0 = arith.constant 0 : i32
    %c0_i32_1 = arith.constant 0 : i32
    return %c0_i32, %c0_i32_0 : i32, i32
  }
  func.func @transform_4(%arg0: i32) -> (i32, i32) {
    %c0_i32 = arith.constant 0 : i32
    %c0_i32_0 = arith.constant 0 : i32
    %c0_i32_1 = arith.constant 0 : i32
    return %c0_i32, %c0_i32_0 : i32, i32
  }
  func.func @transform_5(%arg0: i32) -> (i32, i32) {
    %c0_i32 = arith.constant 0 : i32
    %c0_i32_0 = arith.constant 0 : i32
    %c0_i32_1 = arith.constant 0 : i32
    return %c0_i32, %c0_i32_0 : i32, i32
  }
  func.func @transform_6(%arg0: i32) -> (i32, i32) {
    %c0_i32 = arith.constant 0 : i32
    %c0_i32_0 = arith.constant 0 : i32
    %c0_i32_1 = arith.constant 0 : i32
    return %c0_i32, %c0_i32_0 : i32, i32
  }
  func.func @transform_7(%arg0: i32) -> (i32, i32) {
    %c0_i32 = arith.constant 0 : i32
    %c0_i32_0 = arith.constant 0 : i32
    %c0_i32_1 = arith.constant 0 : i32
    return %c0_i32, %c0_i32_0 : i32, i32
  }
  func.func @transform_8(%arg0: i32) -> (i32, i32, i32) {
    %c0_i32 = arith.constant 0 : i32
    %c0_i32_0 = arith.constant 0 : i32
    %c0_i32_1 = arith.constant 0 : i32
    %c0_i32_2 = arith.constant 0 : i32
    return %c0_i32, %c0_i32_0, %c0_i32_1 : i32, i32, i32
  }
  func.func @transform_9(%arg0: i32) -> (i32, i32) {
    %c0_i32 = arith.constant 0 : i32
    %c0_i32_0 = arith.constant 0 : i32
    %c0_i32_1 = arith.constant 0 : i32
    return %c0_i32, %c0_i32_0 : i32, i32
  }
  func.func @transform_10(%arg0: i32) -> (i32, i32) {
    %c0_i32 = arith.constant 0 : i32
    %c0_i32_0 = arith.constant 0 : i32
    %c0_i32_1 = arith.constant 0 : i32
    return %c0_i32, %c0_i32_0 : i32, i32
  }
  func.func @transform_11(%arg0: i32) -> (i32, i32) {
    %c0_i32 = arith.constant 0 : i32
    %c0_i32_0 = arith.constant 0 : i32
    %c0_i32_1 = arith.constant 0 : i32
    return %c0_i32, %c0_i32_0 : i32, i32
  }
  func.func @transform_12(%arg0: i32) -> (i32, i32) {
    %c0_i32 = arith.constant 0 : i32
    %c0_i32_0 = arith.constant 0 : i32
    %c0_i32_1 = arith.constant 0 : i32
    return %c0_i32, %c0_i32_0 : i32, i32
  }
  func.func @transform_13(%arg0: i32) -> (i32, i32) {
    %c0_i32 = arith.constant 0 : i32
    %c0_i32_0 = arith.constant 0 : i32
    %c0_i32_1 = arith.constant 0 : i32
    return %c0_i32, %c0_i32_0 : i32, i32
  }
  func.func @transform_14(%arg0: i32) -> (i32, i32) {
    %c0_i32 = arith.constant 0 : i32
    %c0_i32_0 = arith.constant 0 : i32
    %c0_i32_1 = arith.constant 0 : i32
    return %c0_i32, %c0_i32_0 : i32, i32
  }
  func.func @transform_15(%arg0: i32) -> (i32, i32, i32) {
    %c0_i32 = arith.constant 0 : i32
    %c0_i32_0 = arith.constant 0 : i32
    %c0_i32_1 = arith.constant 0 : i32
    %c0_i32_2 = arith.constant 0 : i32
    return %c0_i32, %c0_i32_0, %c0_i32_1 : i32, i32, i32
  }
  func.func @transform_16(%arg0: i32) -> (i32, i32) {
    %c0_i32 = arith.constant 0 : i32
    %c0_i32_0 = arith.constant 0 : i32
    %c0_i32_1 = arith.constant 0 : i32
    return %c0_i32, %c0_i32_0 : i32, i32
  }
  func.func @transform_17(%arg0: i32) -> (i32, i32) {
    %c0_i32 = arith.constant 0 : i32
    %c0_i32_0 = arith.constant 0 : i32
    %c0_i32_1 = arith.constant 0 : i32
    return %c0_i32, %c0_i32_0 : i32, i32
  }
  func.func @transform_18(%arg0: i32) -> (i32, i32) {
    %c0_i32 = arith.constant 0 : i32
    %c0_i32_0 = arith.constant 0 : i32
    %c0_i32_1 = arith.constant 0 : i32
    return %c0_i32, %c0_i32_0 : i32, i32
  }
  func.func @transform_19(%arg0: i32) -> (i32, i32) {
    %c0_i32 = arith.constant 0 : i32
    %c0_i32_0 = arith.constant 0 : i32
    %c0_i32_1 = arith.constant 0 : i32
    return %c0_i32, %c0_i32_0 : i32, i32
  }
  func.func @transform_20(%arg0: i32) -> (i32, i32) {
    %c0_i32 = arith.constant 0 : i32
    %c0_i32_0 = arith.constant 0 : i32
    %c0_i32_1 = arith.constant 0 : i32
    return %c0_i32, %c0_i32_0 : i32, i32
  }
  func.func @transform_21(%arg0: i32) -> (i32, i32) {
    %c0_i32 = arith.constant 0 : i32
    %c0_i32_0 = arith.constant 0 : i32
    %c0_i32_1 = arith.constant 0 : i32
    return %c0_i32, %c0_i32_0 : i32, i32
  }
  func.func @transform_22(%arg0: i32) -> (i32, i32, i32) {
    %c0_i32 = arith.constant 0 : i32
    %c0_i32_0 = arith.constant 0 : i32
    %c0_i32_1 = arith.constant 0 : i32
    %c0_i32_2 = arith.constant 0 : i32
    return %c0_i32, %c0_i32_0, %c0_i32_1 : i32, i32, i32
  }
  func.func @transform_23(%arg0: i32) -> (i32, i32) {
    %c0_i32 = arith.constant 0 : i32
    %c0_i32_0 = arith.constant 0 : i32
    %c0_i32_1 = arith.constant 0 : i32
    return %c0_i32, %c0_i32_0 : i32, i32
  }
  func.func @transform_24(%arg0: i32) -> (i32, i32) {
    %c0_i32 = arith.constant 0 : i32
    %c0_i32_0 = arith.constant 0 : i32
    %c0_i32_1 = arith.constant 0 : i32
    return %c0_i32, %c0_i32_0 : i32, i32
  }
  func.func @transform_25(%arg0: i32) -> (i32, i32) {
    %c0_i32 = arith.constant 0 : i32
    %c0_i32_0 = arith.constant 0 : i32
    %c0_i32_1 = arith.constant 0 : i32
    return %c0_i32, %c0_i32_0 : i32, i32
  }
  func.func @transform_26(%arg0: i32) -> (i32, i32) {
    %c0_i32 = arith.constant 0 : i32
    %c0_i32_0 = arith.constant 0 : i32
    %c0_i32_1 = arith.constant 0 : i32
    return %c0_i32, %c0_i32_0 : i32, i32
  }
  func.func @transform_27(%arg0: i32) -> (i32, i32) {
    %c0_i32 = arith.constant 0 : i32
    %c0_i32_0 = arith.constant 0 : i32
    %c0_i32_1 = arith.constant 0 : i32
    return %c0_i32, %c0_i32_0 : i32, i32
  }
  func.func @transform_28(%arg0: i32) -> (i32, i32) {
    %c0_i32 = arith.constant 0 : i32
    %c0_i32_0 = arith.constant 0 : i32
    %c0_i32_1 = arith.constant 0 : i32
    return %c0_i32, %c0_i32_0 : i32, i32
  }
  func.func @transform_29(%arg0: i32) -> (i32, i32) {
    %c0_i32 = arith.constant 0 : i32
    %c0_i32_0 = arith.constant 0 : i32
    %c0_i32_1 = arith.constant 0 : i32
    return %c0_i32, %c0_i32_0 : i32, i32
  }
  func.func @transform_30(%arg0: i32) -> (i32, i32) {
    %c0_i32 = arith.constant 0 : i32
    %c0_i32_0 = arith.constant 0 : i32
    %c0_i32_1 = arith.constant 0 : i32
    return %c0_i32, %c0_i32_0 : i32, i32
  }
  func.func @transform_31(%arg0: i32) -> (i32, i32) {
    %c0_i32 = arith.constant 0 : i32
    %c0_i32_0 = arith.constant 0 : i32
    %c0_i32_1 = arith.constant 0 : i32
    return %c0_i32, %c0_i32_0 : i32, i32
  }
  func.func @transform_32(%arg0: i32) -> (i32, i32) {
    %c0_i32 = arith.constant 0 : i32
    %c0_i32_0 = arith.constant 0 : i32
    %c0_i32_1 = arith.constant 0 : i32
    return %c0_i32, %c0_i32_0 : i32, i32
  }
  func.func @transform_33(%arg0: i32) -> (i32, i32) {
    %c0_i32 = arith.constant 0 : i32
    %c0_i32_0 = arith.constant 0 : i32
    %c0_i32_1 = arith.constant 0 : i32
    return %c0_i32, %c0_i32_0 : i32, i32
  }
  func.func @transform_34(%arg0: i32) -> (i32, i32) {
    %c0_i32 = arith.constant 0 : i32
    %c0_i32_0 = arith.constant 0 : i32
    %c0_i32_1 = arith.constant 0 : i32
    return %c0_i32, %c0_i32_0 : i32, i32
  }
  func.func @transform_35(%arg0: i32) -> (i32, i32, i32) {
    %c0_i32 = arith.constant 0 : i32
    %c0_i32_0 = arith.constant 0 : i32
    %c0_i32_1 = arith.constant 0 : i32
    return %arg0, %c0_i32, %c0_i32_0 : i32, i32, i32
  }
}

</mosaic_0001>

<bundles_post_ra>
// kernel: tpu_custom_call.1
= control target key start
LH: loop header
LB: loop body
LE: loop exit
PB: predicated region body
PF: predicated region fallthrough
CT: control target
= control target key end

     0   :  { %s4592_s6 = smov 1   ;;  %vm197_vm0 = vcmask 523264   ;;  %s4593_s10 = smov 2   ;;  %vm4596_vm1 = vmmov 0   ;;  %vm709_vm2 = vcmask 261120   ;;  %vm889_vm3 = vcmask 31744   ;;  %s5198_s0 = inlined_call_operand.smem [shape: u32[36], index: -1, kind: input, shape index: {}] }
   0x1   :  { %s1_s5 = sld [smem:[%s5198_s0]]   ;;  %s4594_s14 = smov 64   ;;  %vm892_vm4 = vcmask 64512   ;;  %vm970_vm5 = vcmask 15360   ;;  %vm983_vm6 = vcmask 1041408   ;;  %vm1535_vm11 = vcmask 130048  }
   0x2   :  { %s4645_s9 = sld [smem:[%s5198_s0 + %s4592_s6]]   ;;  %s4597_s15 = smov 3   ;;  %vm2633_vm15 = vcmask 1043456  }
   0x3   :  { %s4666_s13 = sld [smem:[%s5198_s0 + %s4593_s10]]   ;;  %s4598_s19 = smov 4  }
   0x4   :  { %s3581_s18 = sld [smem:[%s5198_s0 + %s4597_s15]]   ;;  %s4599_s23 = smov 124  }
   0x5   :  { %s4726_s22 = sld [smem:[%s5198_s0 + %s4598_s19]]   ;;  %s4600_s24 = smov 5  }
   0x6   :  { %s3583_s27 = sld [smem:[%s5198_s0 + %s4600_s24]]   ;;  %s4601_s28 = smov 6  }
   0x7   :  { %v4500_v0 = vld [vmem:[%s1_s5 + $0x18] sm:$0xff]   ;;  %v4501_v1 = vld [vmem:[%s1_s5 + $0x10] sm:$0xff]   ;;  %v4502_v2 = vld [vmem:[%s1_s5 + $0x8] sm:$0xff]   ;;  %s3584_s1 = sld [smem:[%s5198_s0 + %s4601_s28]]   ;;  %s4602_s2 = smov 8  }
   0x8   :  { %4051 = vmatprep.subr.bf16.mxu1 %v4500_v0  ;;  %4039 = vmatprep.subr.bf16.mxu0 %v4500_v0  ;;  %v4504_v3 = vld [vmem:[%s4645_s9 + $0x10] sm:$0xff]   ;;  %v4503_v4 = vld [vmem:[%s1_s5] sm:$0xff]   ;;  %v4505_v6 = vld [vmem:[%s4645_s9 + $0x18] sm:$0xff]   ;;  %s4803_s5 = sld [smem:[%s5198_s0 + %s4602_s2]]   ;;  %s4603_s6 = smov 7  }
   0x9   :  { %4052 = vmatpush3.bf16.msra.mxu1 %v4500_v0  ;;  %4040 = vmatpush3.bf16.msra.mxu0 %v4500_v0  ;;  %v4508_v5 = vld [vmem:[%s4645_s9] sm:$0xff]   ;;  %v4509_v7 = vld [vmem:[%s4645_s9 + $0x8] sm:$0xff]   ;;  %v4506_v8 = vld [vmem:[%s4645_s9 + $0x30] sm:$0xff]   ;;  %s4604_s10 = smov 9   ;;  %s4605_s15 = smov 10  }
   0xa   :  { %4053 = vmatprep.subr.bf16.mxu1 %v4501_v1  ;;  %4041 = vmatprep.subr.bf16.mxu0 %v4501_v1  ;;  %v4510_v9 = vld [vmem:[%s4645_s9 + $0x20] sm:$0xff]   ;;  %v4507_v10 = vld [vmem:[%s4645_s9 + $0x38] sm:$0xff]   ;;  %v4511_v11 = vld [vmem:[%s4645_s9 + $0x28] sm:$0xff]   ;;  %s3585_s9 = sld [smem:[%s5198_s0 + %s4603_s6]]   ;;  %s4609_s28 = smov 13  }
   0xb   :  { %4059 = vmatprep.mubr.msk.bf16.mxu1 %vm197_vm0, %v4504_v3  ;;  %4047 = vmatprep.mubr.msk.bf16.mxu0 %vm197_vm0, %v4508_v5  ;;  %v4512_v12 = vld [vmem:[%s4666_s13 + $0x78] sm:$0xff]   ;;  %v4514_v14 = vld [vmem:[%s4666_s13 + $0x70] sm:$0xff]   ;;  %v4516_v16 = vld [vmem:[%s4666_s13 + $0x68] sm:$0xff]   ;;  %s4611_s6 = smov 15   ;;  %s4624_s24 = smov 26  }
   0xc   :  { %v4513_v13 = vld [vmem:[%s4666_s13 + $0x38] sm:$0xff]   ;;  %v4515_v15 = vld [vmem:[%s4666_s13 + $0x30] sm:$0xff]   ;;  %v4517_v17 = vld [vmem:[%s4666_s13 + $0x28] sm:$0xff]   ;;  %s4626_s29 = smov 27   ;;  %s4627_s3 = smov 28  }
   0xd   :  { %4054 = vmatpush3.bf16.msra.mxu1 %v4501_v1  ;;  %4042 = vmatpush3.bf16.msra.mxu0 %v4501_v1  ;;  %v4518_v18 = vld [vmem:[%s4666_s13 + $0x60] sm:$0xff]   ;;  %v4520_v20 = vld [vmem:[%s4666_s13 + $0x58] sm:$0xff]   ;;  %v4522_v24 = vld [vmem:[%s4666_s13 + $0x50] sm:$0xff]   ;;  %s4628_s7 = smov 29   ;;  %s4633_s30 = smov 35  }
   0xe   :  { %4055 = vmatprep.subr.bf16.mxu1 %v4502_v2  ;;  %4043 = vmatprep.subr.bf16.mxu0 %v4502_v2  ;;  %v4519_v19 = vld [vmem:[%s4666_s13 + $0x20] sm:$0xff]   ;;  %v4521_v21 = vld [vmem:[%s4666_s13 + $0x18] sm:$0xff]   ;;  %v4523_v25 = vld [vmem:[%s4666_s13 + $0x10] sm:$0xff]  }
   0xf   :  { %v4524_v27 = vld [vmem:[%s4666_s13 + $0x48] sm:$0xff]   ;;  %v4526_v30 = vld [vmem:[%s4666_s13 + $0x40] sm:$0xff]  }
  0x10   :  { %v4525_v28 = vld [vmem:[%s4666_s13 + $0x8] sm:$0xff]   ;;  %v4527_v32 = vld [vmem:[%s4666_s13] sm:$0xff]   ;;  %s4840_s13 = sld [smem:[%s5198_s0 + %s4604_s10]]   ;;  %s4612_s10 = smov 16  }
  0x11   :  { %4056 = vmatpush3.bf16.msra.mxu1 %v4502_v2  ;;  %4044 = vmatpush3.bf16.msra.mxu0 %v4502_v2 }
  0x12   :  { %4057 = vmatprep.subr.bf16.mxu1 %v4503_v4  ;;  %4045 = vmatprep.subr.bf16.mxu0 %v4503_v4 }
  0x15   :  { %4058 = vmatpush3.bf16.msra.mxu1 %v4503_v4  ;;  %4046 = vmatpush3.bf16.msra.mxu0 %v4503_v4 }
  0x16   :  { %4075 = vmatprep.subr.bf16.mxu1 %v4500_v0  ;;  %4063 = vmatprep.subr.bf16.mxu0 %v4500_v0 }
  0x18   :  { %4060 = vmatmul.mubr.msk.bf16.vlgmr.msra.gmra.mxu1 %vm197_vm0, %v4505_v6  ;;  %4048 = vmatmul.mubr.msk.bf16.vlgmr.msra.gmra.mxu0 %vm197_vm0, %v4509_v7 }
  0x19   :  { %4076 = vmatpush3.bf16.msra.mxu1 %v4500_v0  ;;  %4083 = vmatprep.mubr.msk.bf16.mxu1 %vm197_vm0, %v4506_v8 }
  0x1a   :  { %4077 = vmatprep.subr.bf16.mxu1 %v4501_v1  ;;  %4064 = vmatpush3.bf16.msra.mxu0 %v4500_v0 }
  0x1b   :  { %4065 = vmatprep.subr.bf16.mxu0 %v4501_v1  ;;  %4071 = vmatprep.mubr.msk.bf16.mxu0 %vm197_vm0, %v4510_v9 }
  0x1d   :  { %4078 = vmatpush3.bf16.msra.mxu1 %v4501_v1 }
  0x1e   :  { %4079 = vmatprep.subr.bf16.mxu1 %v4502_v2  ;;  %4066 = vmatpush3.bf16.msra.mxu0 %v4501_v1 }
  0x1f   :  { %4067 = vmatprep.subr.bf16.mxu0 %v4502_v2 }
  0x21   :  { %4080 = vmatpush3.bf16.msra.mxu1 %v4502_v2 }
  0x22   :  { %4081 = vmatprep.subr.bf16.mxu1 %v4503_v4  ;;  %4068 = vmatpush3.bf16.msra.mxu0 %v4502_v2 }
  0x23   :  { %4069 = vmatprep.subr.bf16.mxu0 %v4503_v4 }
  0x25   :  { %4082 = vmatpush3.bf16.msra.mxu1 %v4503_v4 }
  0x26   :  { %4070 = vmatpush3.bf16.msra.mxu0 %v4503_v4 }
  0x27   :  { %3798 = vmatprep.subr.bf16.mxu0 %v4512_v12  ;;  %v4595_v12 = vmov 0.0  }
  0x28   :  { %4084 = vmatmul.mubr.msk.bf16.vlgmr.msra.gmra.mxu1 %vm197_vm0, %v4507_v10  ;;  %4087 = vmatprep.subr.mxu1 %v4595_v12 }
  0x29   :  { %4072 = vmatmul.mubr.msk.bf16.vlgmr.msra.gmra.mxu0 %vm197_vm0, %v4511_v11  ;;  %4095 = vmatprep.mubr.msk.f32.mxu1 %vm4596_vm1, %v4595_v12 }
  0x2a   :  { %3799 = vmatpush3.bf16.msra.mxu0 %v4513_v13 }
  0x2b   :  { %3800 = vmatprep.subr.bf16.mxu0 %v4514_v14 }
  0x2e   :  { %3801 = vmatpush3.bf16.msra.mxu0 %v4515_v15 }
  0x2f   :  { %3802 = vmatprep.subr.bf16.mxu0 %v4516_v16 }
  0x32   :  { %3803 = vmatpush3.bf16.msra.mxu0 %v4517_v17 }
  0x33   :  { %3804 = vmatprep.subr.bf16.mxu0 %v4518_v18 }
  0x36   :  { %3805 = vmatpush3.bf16.msra.mxu0 %v4519_v19 }
  0x37   :  { %3806 = vmatprep.subr.bf16.mxu0 %v4520_v20 }
  0x3a   :  { %3807 = vmatpush3.bf16.msra.mxu0 %v4521_v21 }
  0x3b   :  { %3808 = vmatprep.subr.bf16.mxu0 %v4522_v24 }
  0x3e   :  { %3809 = vmatpush3.bf16.msra.mxu0 %v4523_v25 }
  0x3f   :  { %3810 = vmatprep.subr.bf16.mxu0 %v4524_v27 }
  0x42   :  { %3811 = vmatpush3.bf16.msra.mxu0 %v4525_v28 }
  0x43   :  { %3812 = vmatprep.subr.bf16.mxu0 %v4526_v30 }
  0x46   :  { %3813 = vmatpush3.bf16.msra.mxu0 %v4527_v32  ;;  %v708_v32 = vld [vmem:[%s3581_s18] sm:$0x3]  ;;  %s3588_s18 = sld [smem:[%s5198_s0 + %s4605_s15]]   ;;  %s4613_s15 = smov 17  }
  0xd8   :  { %v4061_v22 = vpop.f32.mrf.mxu1  ;;  %v4049_v40 = vpop.f32.mrf.mxu0 }
  0xda   :  { %v308_v23 = vpop.f32.mrf.mxu1  ;;  %v238_v41 = vpop.f32.mrf.mxu0 }
  0xdc   :  { %v4062_v26 = vpop.f32.mrf.mxu1  ;;  %v4050_v42 = vpop.f32.mrf.mxu0 }
  0xdd   :  { %v4475_v38 = vpack.i.bf16 %v4062_v26, %v4061_v22 }
  0xde   :  { %v311_v29 = vpop.f32.mrf.mxu1  ;;  %v241_v43 = vpop.f32.mrf.mxu0 }
  0xdf   :  { %v4465_v39 = vpack.i.bf16 %v311_v29, %v308_v23 }
  0xe8   :  { %v4085_v31 = vpop.f32.mrf.mxu1 }
  0xe9   :  { %v4073_v44 = vpop.f32.mrf.mxu0 }
  0xea   :  { %v448_v33 = vpop.f32.mrf.mxu1 }
  0xeb   :  { %v378_v45 = vpop.f32.mrf.mxu0 }
  0xec   :  { %v4086_v34 = vpop.f32.mrf.mxu1 }
  0xed   :  { %v4470_v35 = vpack.i.bf16 %v4086_v34, %v4085_v31  ;;  %v4074_v46 = vpop.f32.mrf.mxu0  ;;  %v798_v34 = vld [vmem:[%s4726_s22 + $0x78] sm:$0xff] }
  0xee   :  { %v451_v36 = vpop.f32.mrf.mxu1 }
  0xef   :  { %v4460_v37 = vpack.i.bf16 %v451_v36, %v448_v33  ;;  %4471 = vrot.lane.b32.xlu1 %v4470_v35, %s4594_s14  ;;  %v381_v53 = vpop.f32.mrf.mxu0  ;;  %v797_v35 = vld [vmem:[%s4726_s22 + $0x70] sm:$0xff]  ;;  %v796_v36 = vld [vmem:[%s4726_s22 + $0x68] sm:$0xff] }
  0xf1   :  { %4461 = vrot.lane.b32.xlu0 %v4460_v37, %s4594_s14  ;;  %v795_v37 = vld [vmem:[%s4726_s22 + $0x60] sm:$0xff] }
  0xf3   :  { %4476 = vrot.lane.b32.xlu1 %v4475_v38, %s4594_s14  ;;  %v794_v38 = vld [vmem:[%s4726_s22 + $0x58] sm:$0xff] }
  0xf5   :  { %4466 = vrot.lane.b32.xlu0 %v4465_v39, %s4594_s14  ;;  %v793_v39 = vld [vmem:[%s4726_s22 + $0x50] sm:$0xff] }
 0x161   :  { %v4472_v47 = vpop.permute.xlu1 %4471 }
 0x162   :  { %v4474_v51 = vunpack.i.h.bf16 %v4472_v47  ;;  %v4473_v52 = vunpack.i.l.bf16 %v4472_v47  ;;  %v785_v47 = vld [vmem:[%s4726_s22 + $0x10] sm:$0xff] }
 0x163   :  { %v4462_v48 = vpop.permute.xlu0 %4461 }
 0x164   :  { %v4464_v49 = vunpack.i.h.bf16 %v4462_v48  ;;  %v4463_v50 = vunpack.i.l.bf16 %v4462_v48  ;;  %v501_v61 = vsel %vm197_vm0, %v4073_v44, %v4473_v52  ;;  %v502_v62 = vsel %vm197_vm0, %v4074_v46, %v4474_v51  ;;  %v788_v44 = vld [vmem:[%s4726_s22 + $0x28] sm:$0xff]  ;;  %v786_v46 = vld [vmem:[%s4726_s22 + $0x18] sm:$0xff] }
 0x165   :  { %v4477_v60 = vpop.permute.xlu1 %4476  ;;  %v506_v4 = vpack.c.bf16 %v502_v62, %v501_v61  ;;  %v784_v48 = vld [vmem:[%s4726_s22 + $0x8] sm:$0xff]  ;;  %v891_v61 = vld [vmem:[%s3583_s27] sm:$0xff]  ;;  %s4608_s27 = smov 120  }
 0x166   :  { %v499_v54 = vsel %vm197_vm0, %v378_v45, %v4463_v50  ;;  %v500_v55 = vsel %vm197_vm0, %v381_v53, %v4464_v49  ;;  %v4479_v2 = vunpack.i.h.bf16 %v4477_v60  ;;  %v4478_v3 = vunpack.i.l.bf16 %v4477_v60  ;;  %v787_v45 = vld [vmem:[%s4726_s22 + $0x20] sm:$0xff] }
 0x167   :  { %v4467_v56 = vpop.permute.xlu0 %4466  ;;  %v504_v57 = vpack.c.bf16 %v500_v55, %v499_v54  ;;  %v783_v49 = vld [vmem:[%s4726_s22] sm:$0xff] }
 0x168   :  { %v4469_v58 = vunpack.i.h.bf16 %v4467_v56  ;;  %v4468_v59 = vunpack.i.l.bf16 %v4467_v56  ;;  %v497_v5 = vsel %vm197_vm0, %v4049_v40, %v4478_v3  ;;  %v498_v6 = vsel %vm197_vm0, %v4050_v42, %v4479_v2  ;;  %v792_v40 = vld [vmem:[%s4726_s22 + $0x48] sm:$0xff]  ;;  %v790_v42 = vld [vmem:[%s4726_s22 + $0x38] sm:$0xff]  ;;  %v966_v3 = vld [vmem:[%s3584_s1] sm:$0xff] }
 0x169   :  { %667 = vmatprep.mubr.bf16.mxu0 %v504_v57  ;;  %v505_v7 = vpack.c.bf16 %v498_v6, %v497_v5  ;;  %v967_v5 = vld [vmem:[%s3584_s1 + $0x8] sm:$0xff]  ;;  %v968_v6 = vld [vmem:[%s3584_s1 + $0x10] sm:$0xff] }
 0x16a   :  { %v495_v63 = vsel %vm197_vm0, %v238_v41, %v4468_v59  ;;  %v496_v0 = vsel %vm197_vm0, %v241_v43, %v4469_v58  ;;  %v791_v41 = vld [vmem:[%s4726_s22 + $0x40] sm:$0xff]  ;;  %v789_v43 = vld [vmem:[%s4726_s22 + $0x30] sm:$0xff] }
 0x16b   :  { %v503_v1 = vpack.c.bf16 %v496_v0, %v495_v63 }
 0x16d   :  { %668 = vmatmul.mubr.bf16.vlgmr.msra.gmra.mxu0 %v503_v1 }
 0x16e   :  { %675 = vmatprep.mubr.bf16.mxu0 %v506_v4 }
 0x175   :  { %676 = vmatmul.mubr.bf16.gmra.mxu0 %v505_v7 }
 0x176   :  { %4140 = vmatprep.mubr.msk.f32.mxu0 %vm970_vm5, %v966_v3 }
 0x22d   :  { %v3814_v8 = vpop.f32.mrf.mxu0 }
 0x22f   :  { %v3815_v9 = vpop.f32.mrf.mxu0 }
 0x230   :  { %v4699_v17 = vadd.f32 %v3815_v9, %v3814_v8  ;;  %v969_v8 = vld [vmem:[%s3584_s1 + $0x18] sm:$0xff]  ;;  %s3591_s1 = sld [smem:[%s5198_s0 + %s4609_s28]]   ;;  %s4617_s28 = smov 20  }
 0x231   :  { %v3817_v10 = vpop.f32.mrf.mxu0 }
 0x232   :  { %v684_v23 = vmul.f32 %v4699_v17, %v4699_v17 }
 0x233   :  { %v3818_v11 = vpop.f32.mrf.mxu0 }
 0x234   :  { %v4708_v21 = vadd.f32 %v3818_v11, %v3817_v10 }
 0x235   :  { %v3820_v13 = vpop.f32.mrf.mxu0 }
 0x236   :  { %v685_v24 = vmul.f32 %v4708_v21, %v4708_v21 }
 0x237   :  { %v3821_v14 = vpop.f32.mrf.mxu0 }
 0x238   :  { %v4697_v15 = vadd.f32 %v3821_v14, %v3820_v13 }
 0x239   :  { %v3823_v16 = vpop.f32.mrf.mxu0 }
 0x23a   :  { %v686_v18 = vmul.f32 %v4697_v15, %v4697_v15 }
 0x23b   :  { %v3824_v19 = vpop.f32.mrf.mxu0 }
 0x23c   :  { %v4705_v20 = vadd.f32 %v3824_v19, %v3823_v16  ;;  %696 = vrot.lane.b32.xlu1 %v686_v18, %s4594_s14  ;;  %v3669_v16 = vld [vmem:[%s3585_s9] ss:$0 sm:$0xff] }
 0x23e   :  { %v687_v22 = vmul.f32 %v4705_v20, %v4705_v20 }
 0x240   :  { %698 = vrot.lane.b32.xlu0 %v687_v22, %s4594_s14  ;;  %692 = vrot.lane.b32.xlu1 %v684_v23, %s4594_s14  ;;  %v3670_v23 = vld [vmem:[%s3585_s9 + $0x1] ss:$0 sm:$0xff]  ;;  %s3593_s9 = sld [smem:[%s5198_s0 + %s4611_s6]]   ;;  %s4619_s6 = smov 22  }
 0x244   :  { %694 = vrot.lane.b32.xlu0 %v685_v24, %s4594_s14 }
 0x2ae   :  { %v697_v25 = vpop.permute.xlu1 %696 }
 0x2af   :  { %v706_v28 = vsel %vm197_vm0, %v4697_v15, %v697_v25 }
 0x2b2   :  { %v699_v26 = vpop.permute.xlu0 %698  ;;  %v693_v29 = vpop.permute.xlu1 %692 }
 0x2b3   :  { %v707_v27 = vsel %vm197_vm0, %v4705_v20, %v699_v26  ;;  %v704_v33 = vsel %vm197_vm0, %v4699_v17, %v693_v29 }
 0x2b4   :  { %4088 = vmatpush3.msra.mxu1 %v707_v27 }
 0x2b5   :  { %4089 = vmatprep.subr.mxu1 %v4595_v12 }
 0x2b6   :  { %4090 = vmatpush3.msra.mxu1 %v706_v28  ;;  %v695_v30 = vpop.permute.xlu0 %694 }
 0x2b7   :  { %v705_v31 = vsel %vm197_vm0, %v4708_v21, %v695_v30  ;;  %4091 = vmatprep.subr.mxu1 %v4595_v12 }
 0x2b8   :  { %4092 = vmatpush3.msra.mxu1 %v705_v31 }
 0x2b9   :  { %4093 = vmatprep.subr.mxu1 %v4595_v12 }
 0x2ba   :  { %4094 = vmatpush3.msra.mxu1 %v704_v33 }
 0x2bb   :  { %4096 = vmatmul.mubr.msk.f32.vlgmr.msra.gmra.mxu1 %vm709_vm2, %v708_v32  ;;  %4098 = vmatprep.subr.mxu1 %v4595_v12 }
 0x2bc   :  { %4099 = vmatpush3.msra.mxu1 %v798_v34  ;;  %4130 = vmatprep.mubr.msk.f32.mxu1 %vm4596_vm1, %v4595_v12 }
 0x2bd   :  { %4100 = vmatprep.subr.mxu1 %v4595_v12 }
 0x2be   :  { %4101 = vmatpush3.msra.mxu1 %v797_v35 }
 0x2bf   :  { %4102 = vmatprep.subr.mxu1 %v4595_v12 }
 0x2c0   :  { %4103 = vmatpush3.msra.mxu1 %v796_v36 }
 0x2c1   :  { %4104 = vmatprep.subr.mxu1 %v4595_v12 }
 0x2c2   :  { %4105 = vmatpush3.msra.mxu1 %v795_v37 }
 0x2c3   :  { %4106 = vmatprep.subr.mxu1 %v4595_v12 }
 0x2c4   :  { %4107 = vmatpush3.msra.mxu1 %v794_v38 }
 0x2c5   :  { %4108 = vmatprep.subr.mxu1 %v4595_v12 }
 0x2c6   :  { %4109 = vmatpush3.msra.mxu1 %v793_v39 }
 0x2c7   :  { %4110 = vmatprep.subr.mxu1 %v4595_v12 }
 0x2c8   :  { %4111 = vmatpush3.msra.mxu1 %v792_v40 }
 0x2c9   :  { %4112 = vmatprep.subr.mxu1 %v4595_v12 }
 0x2ca   :  { %4113 = vmatpush3.msra.mxu1 %v791_v41 }
 0x2cb   :  { %4114 = vmatprep.subr.mxu1 %v4595_v12 }
 0x2cc   :  { %4115 = vmatpush3.msra.mxu1 %v790_v42  ;;  %v4528_v42 = vld [vmem:[%s4803_s5 + $0x8] sm:$0xff]  }
 0x2cd   :  { %4116 = vmatprep.subr.mxu1 %v4595_v12 }
 0x2ce   :  { %4117 = vmatpush3.msra.mxu1 %v789_v43  ;;  %v4529_v43 = vld [vmem:[%s4803_s5] sm:$0xff]  }
 0x2cf   :  { %4118 = vmatprep.subr.mxu1 %v4595_v12 }
 0x2d0   :  { %4119 = vmatpush3.msra.mxu1 %v788_v44  ;;  %v4530_v44 = vld [vmem:[%s4803_s5 + $0x18] sm:$0xff]  }
 0x2d1   :  { %4120 = vmatprep.subr.mxu1 %v4595_v12 }
 0x2d2   :  { %4121 = vmatpush3.msra.mxu1 %v787_v45  ;;  %v4531_v45 = vld [vmem:[%s4803_s5 + $0x10] sm:$0xff]  }
 0x2d3   :  { %4122 = vmatprep.subr.mxu1 %v4595_v12 }
 0x2d4   :  { %4123 = vmatpush3.msra.mxu1 %v786_v46  ;;  %v4532_v46 = vld [vmem:[%s4840_s13 + $0x78] sm:$0xff]  }
 0x2d5   :  { %4124 = vmatprep.subr.mxu1 %v4595_v12 }
 0x2d6   :  { %4125 = vmatpush3.msra.mxu1 %v785_v47  ;;  %v4533_v47 = vld [vmem:[%s4840_s13 + $0x38] sm:$0xff]  }
 0x2d7   :  { %4126 = vmatprep.subr.mxu1 %v4595_v12 }
 0x2d8   :  { %4127 = vmatpush3.msra.mxu1 %v784_v48  ;;  %v4534_v48 = vld [vmem:[%s4840_s13 + $0x70] sm:$0xff]  }
 0x2d9   :  { %4128 = vmatprep.subr.mxu1 %v4595_v12 }
 0x2da   :  { %4129 = vmatpush3.msra.mxu1 %v783_v49  ;;  %v4535_v49 = vld [vmem:[%s4840_s13 + $0x30] sm:$0xff]  }
 0x2db   :  { %4133 = vmatprep.subr.mxu1 %v4595_v12 }
 0x37b   :  { %v779_v50 = vpop.f32.mrf.mxu1 }
 0x37c   :  { %4131 = vmatmul.mubr.f32.vlgmr.msra.gmra.mxu1 %v779_v50  ;;  %v4536_v50 = vld [vmem:[%s4840_s13 + $0x68] sm:$0xff]  }
 0x37d   :  { %v4097_v51 = vpop.f32.mrf.mxu1  ;;  %4135 = vmatprep.mubr.msk.f32.mxu1 %vm4596_vm1, %v4595_v12  ;;  %4134 = vmatpush3.msra.mxu1 %v891_v61 }
 0x37e   :  { %4146 = vmatprep.subr.bf16.mxu1 %v4595_v12  ;;  %v4537_v51 = vld [vmem:[%s4840_s13 + $0x28] sm:$0xff]  }
 0x43c   :  { %v865_v52 = vpop.f32.mrf.mxu1 }
 0x43d   :  { %v869_v53 = vmul.f32 0.00390625, %v865_v52  ;;  %v4538_v52 = vld [vmem:[%s4840_s13 + $0x60] sm:$0xff]  }
 0x43e   :  { %v4132_v54 = vpop.f32.mrf.mxu1 }
 0x43f   :  { %v870_v55 = vmul.f32 %v869_v53, %v869_v53  ;;  %v879_v62 = vsub.f32 0.0, %v869_v53  ;;  %v4540_v54 = vld [vmem:[%s4840_s13 + $0x58] sm:$0xff]  }
 0x441   :  { %872 = vrot.lane.b32.xlu0 %v870_v55, %s4598_s19  ;;  %v4541_v55 = vld [vmem:[%s4840_s13 + $0x18] sm:$0xff]  }
 0x4b3   :  { %v873_v56 = vpop.permute.xlu0 %872 }
 0x4b4   :  { %v875_v57 = vsub.f32 %v869_v53, %v873_v56  ;;  %v4539_v53 = vld [vmem:[%s4840_s13 + $0x20] sm:$0xff]   ;;  %v4542_v56 = vld [vmem:[%s4840_s13 + $0x50] sm:$0xff]  }
 0x4b6   :  { %v876_v58 = vmax.f32 %v875_v57, 0.0  ;;  %v4543_v57 = vld [vmem:[%s4840_s13 + $0x10] sm:$0xff]  }
 0x4b8   :  { %v877_v59 = vadd.f32 1e-05, %v876_v58  ;;  %v4544_v58 = vld [vmem:[%s4840_s13 + $0x48] sm:$0xff]  }
 0x4ba   :  { %4580 = vrsqrt.f32 %v877_v59  ;;  %v4545_v59 = vld [vmem:[%s4840_s13 + $0x8] sm:$0xff]  }
 0x4c7   :  { %v4581_v60 = vpop.eup %4580 }
 0x4c8   :  { %881 = vrot.lane.b32.xlu1 %v4581_v60, %s4599_s23  ;;  %s4607_s23 = smov 12  }
 0x4c9   :  { %s3590_s26 = sld [smem:[%s5198_s0 + %s4607_s23]]   ;;  %s4615_s23 = smov 19  }
 0x53a   :  { %v882_v63 = vpop.permute.xlu1 %881 }
 0x53b   :  { %v884_v0 = vmul.f32 %v882_v63, %v879_v62 }
 0x53d   :  { %886 = vrot.lane.b32.xlu0 %v884_v0, %s4598_s19  ;;  %v4546_v0 = vld [vmem:[%s4840_s13 + $0x40] sm:$0xff]   ;;  %s4606_s19 = smov 11  }
 0x53e   :  { %s4883_s22 = sld [smem:[%s5198_s0 + %s4606_s19]]   ;;  %s4614_s19 = smov 18  }
 0x5af   :  { %v887_v1 = vpop.permute.xlu0 %886 }
 0x5b0   :  { %v890_v2 = vsel %vm889_vm3, %v882_v63, %v887_v1  ;;  %v4547_v1 = vld [vmem:[%s4840_s13] sm:$0xff]   ;;  %s3594_s13 = sld [smem:[%s5198_s0 + %s4612_s10]]  }
 0x5b1   :  { %4136 = vmatmul.mubr.msk.f32.vlgmr.msra.gmra.mxu1 %vm892_vm4, %v890_v2 }
 0x5b2   :  { %4150 = vmatprep.mubr.msk.bf16.mxu1 %vm4596_vm1, %v4595_v12 }
 0x671   :  { %v962_v4 = vpop.f32.mrf.mxu1 }
 0x672   :  { %4138 = vmatprep.subr.msk.mxu0 %vm983_vm6, %v962_v4 }
 0x673   :  { %v4137_v7 = vpop.f32.mrf.mxu1  ;;  %4139 = vmatpush3.msk.msra.mxu0 %vm983_vm6, %v962_v4 }
 0x674   :  { %4141 = vmatmul.mubr.msk.f32.vlgmr.msra.gmra.mxu0 %vm970_vm5, %v967_v5  ;;  %4154 = vmatprep.subr.bf16.mxu0 %v4595_v12 }
 0x675   :  { %4143 = vmatprep.mubr.msk.f32.mxu0 %vm970_vm5, %v968_v6 }
 0x678   :  { %4144 = vmatmul.mubr.msk.f32.gmra.mxu0 %vm970_vm5, %v969_v8 }
 0x679   :  { %4158 = vmatprep.mubr.msk.bf16.mxu0 %vm4596_vm1, %v4595_v12 }
 0x734   :  { %v4142_v9 = vpop.f32.mrf.mxu0 }
 0x735   :  { %v1073_v25 = vmul.f32 %v4142_v9, %v4708_v21 }
 0x736   :  { %v1053_v10 = vpop.f32.mrf.mxu0 }
 0x737   :  { %v1072_v32 = vmul.f32 %v4699_v17, %v1053_v10 }
 0x738   :  { %v4145_v11 = vpop.f32.mrf.mxu0 }
 0x739   :  { %1086 = vrot.lane.b32.xlu0 %v4145_v11, %s4594_s14  ;;  %v1075_v14 = vmul.f32 %v4145_v11, %v4705_v20 }
 0x73a   :  { %v1063_v13 = vpop.f32.mrf.mxu0 }
 0x73b   :  { %1084 = vrot.lane.b32.xlu1 %v1063_v13, %s4594_s14  ;;  %v1074_v19 = vmul.f32 %v4697_v15, %v1063_v13 }
 0x73d   :  { %1082 = vrot.lane.b32.xlu0 %v4142_v9, %s4594_s14 }
 0x73f   :  { %1080 = vrot.lane.b32.xlu1 %v1053_v10, %s4594_s14 }
 0x7ab   :  { %v1087_v18 = vpop.permute.xlu0 %1086 }
 0x7ac   :  { %v1095_v22 = vadd.f32 %v1087_v18, %v1075_v14 }
 0x7ad   :  { %v1085_v24 = vpop.permute.xlu1 %1084 }
 0x7ae   :  { %v1104_v26 = vadd.f32 %v3669_v16, %v1095_v22  ;;  %v1094_v27 = vadd.f32 %v1085_v24, %v1074_v19 }
 0x7af   :  { %v1083_v28 = vpop.permute.xlu0 %1082 }
 0x7b0   :  { %v1117_v29 = vmul.f32 %v3670_v23, %v1104_v26  ;;  %v1103_v30 = vadd.f32 %v3669_v16, %v1094_v27  ;;  %v1093_v31 = vadd.f32 %v1083_v28, %v1073_v25  ;;  %vm1108_vm7 = vcmp.gt.f32.partialorder %v1104_v26, 0.0 }
 0x7b1   :  { %v1081_v33 = vpop.permute.xlu1 %1080 }
 0x7b2   :  { %vm1107_vm8 = vcmp.gt.f32.partialorder %v1103_v30, 0.0  ;;  %v1116_v20 = vmul.f32 %v3670_v23, %v1103_v30  ;;  %v1102_v34 = vadd.f32 %v3669_v16, %v1093_v31  ;;  %v1092_v35 = vadd.f32 %v1081_v33, %v1072_v32 }
 0x7b3   :  { %v1121_v15 = vsel %vm1108_vm7, %v1104_v26, %v1117_v29 }
 0x7b4   :  { %v1120_v36 = vsel %vm1107_vm8, %v1103_v30, %v1116_v20  ;;  %v1115_v37 = vmul.f32 %v3670_v23, %v1102_v34  ;;  %v1101_v21 = vadd.f32 %v3669_v16, %v1092_v35  ;;  %vm1106_vm9 = vcmp.gt.f32.partialorder %v1102_v34, 0.0 }
 0x7b5   :  { %v1123_v38 = vpack.c.bf16 %v1121_v15, %v1120_v36 }
 0x7b6   :  { %vm1105_vm10 = vcmp.gt.f32.partialorder %v1101_v21, 0.0  ;;  %v1114_v39 = vmul.f32 %v3670_v23, %v1101_v21  ;;  %v1119_v17 = vsel %vm1106_vm9, %v1102_v34, %v1115_v37 }
 0x7b7   :  { %4147 = vmatpush3.bf16.msra.mxu1 %v1123_v38  ;;  %4155 = vmatpush3.bf16.msra.mxu0 %v1123_v38 }
 0x7b8   :  { %4148 = vmatprep.subr.bf16.mxu1 %v4595_v12  ;;  %4156 = vmatprep.subr.bf16.mxu0 %v4595_v12  ;;  %v1118_v40 = vsel %vm1105_vm10, %v1101_v21, %v1114_v39 }
 0x7b9   :  { %v1122_v41 = vpack.c.bf16 %v1119_v17, %v1118_v40  ;;  %v1534_v40 = vld [vmem:[%s3588_s18] sm:$0x3]  ;;  %s3595_s18 = sld [smem:[%s5198_s0 + %s4613_s15]]   ;;  %s4621_s15 = smov 24  }
 0x7bb   :  { %4149 = vmatpush3.bf16.msra.mxu1 %v1122_v41  ;;  %4157 = vmatpush3.bf16.msra.mxu0 %v1122_v41 }
 0x7bc   :  { %4162 = vmatprep.subr.bf16.mxu1 %v4595_v12  ;;  %4170 = vmatprep.subr.bf16.mxu0 %v4595_v12 }
 0x7be   :  { %4159 = vmatmul.mubr.msk.bf16.vlgmr.msra.gmra.mxu0 %vm709_vm2, %v4528_v42  ;;  %4151 = vmatmul.mubr.msk.bf16.vlgmr.msra.gmra.mxu1 %vm709_vm2, %v4529_v43  ;;  %v1624_v42 = vld [vmem:[%s4883_s22 + $0x78] sm:$0xff]  ;;  %v1623_v43 = vld [vmem:[%s4883_s22 + $0x70] sm:$0xff] }
 0x7bf   :  { %4163 = vmatpush3.bf16.msra.mxu1 %v1123_v38  ;;  %4171 = vmatpush3.bf16.msra.mxu0 %v1123_v38 }
 0x7c0   :  { %4164 = vmatprep.subr.bf16.mxu1 %v4595_v12  ;;  %4172 = vmatprep.subr.bf16.mxu0 %v4595_v12 }
 0x7c1   :  { %4174 = vmatprep.mubr.msk.bf16.mxu0 %vm4596_vm1, %v4595_v12  ;;  %4166 = vmatprep.mubr.msk.bf16.mxu1 %vm4596_vm1, %v4595_v12 }
 0x7c3   :  { %4165 = vmatpush3.bf16.msra.mxu1 %v1122_v41  ;;  %4173 = vmatpush3.bf16.msra.mxu0 %v1122_v41 }
 0x7c4   :  { %4178 = vmatprep.subr.mxu0 %v4595_v12  ;;  %3867 = vmatprep.subr.bf16.mxu1 %v4532_v46  ;;  %v1620_v46 = vld [vmem:[%s4883_s22 + $0x58] sm:$0xff] }
 0x7c6   :  { %4175 = vmatmul.mubr.msk.bf16.vlgmr.msra.gmra.mxu0 %vm709_vm2, %v4530_v44  ;;  %4167 = vmatmul.mubr.msk.bf16.vlgmr.msra.gmra.mxu1 %vm709_vm2, %v4531_v45  ;;  %v1622_v44 = vld [vmem:[%s4883_s22 + $0x68] sm:$0xff]  ;;  %v1621_v45 = vld [vmem:[%s4883_s22 + $0x60] sm:$0xff] }
 0x7c7   :  { %4182 = vmatprep.mubr.msk.f32.mxu0 %vm4596_vm1, %v4595_v12  ;;  %3868 = vmatpush3.bf16.msra.mxu1 %v4533_v47  ;;  %v1619_v47 = vld [vmem:[%s4883_s22 + $0x50] sm:$0xff] }
 0x7c8   :  { %3869 = vmatprep.subr.bf16.mxu1 %v4534_v48  ;;  %v1618_v48 = vld [vmem:[%s4883_s22 + $0x48] sm:$0xff] }
 0x7cb   :  { %3870 = vmatpush3.bf16.msra.mxu1 %v4535_v49  ;;  %v1617_v49 = vld [vmem:[%s4883_s22 + $0x40] sm:$0xff] }
 0x7cc   :  { %3871 = vmatprep.subr.bf16.mxu1 %v4536_v50  ;;  %v1616_v50 = vld [vmem:[%s4883_s22 + $0x38] sm:$0xff] }
 0x7cf   :  { %3872 = vmatpush3.bf16.msra.mxu1 %v4537_v51  ;;  %v1615_v51 = vld [vmem:[%s4883_s22 + $0x30] sm:$0xff] }
 0x7d0   :  { %3873 = vmatprep.subr.bf16.mxu1 %v4538_v52  ;;  %v1614_v52 = vld [vmem:[%s4883_s22 + $0x28] sm:$0xff] }
 0x7d3   :  { %3874 = vmatpush3.bf16.msra.mxu1 %v4539_v53  ;;  %v1613_v53 = vld [vmem:[%s4883_s22 + $0x20] sm:$0xff] }
 0x7d4   :  { %3875 = vmatprep.subr.bf16.mxu1 %v4540_v54  ;;  %v1612_v54 = vld [vmem:[%s4883_s22 + $0x18] sm:$0xff] }
 0x7d7   :  { %3876 = vmatpush3.bf16.msra.mxu1 %v4541_v55  ;;  %v1611_v55 = vld [vmem:[%s4883_s22 + $0x10] sm:$0xff] }
 0x7d8   :  { %3877 = vmatprep.subr.bf16.mxu1 %v4542_v56  ;;  %v1610_v56 = vld [vmem:[%s4883_s22 + $0x8] sm:$0xff] }
 0x7db   :  { %3878 = vmatpush3.bf16.msra.mxu1 %v4543_v57  ;;  %v1609_v57 = vld [vmem:[%s4883_s22] sm:$0xff]  ;;  %s4990_s22 = sld [smem:[%s5198_s0 + %s4614_s19]]   ;;  %s4622_s19 = smov 25  }
 0x7dc   :  { %3879 = vmatprep.subr.bf16.mxu1 %v4544_v58 }
 0x7df   :  { %3880 = vmatpush3.bf16.msra.mxu1 %v4545_v59 }
 0x7e0   :  { %3881 = vmatprep.subr.bf16.mxu1 %v4546_v0 }
 0x7e3   :  { %3882 = vmatpush3.bf16.msra.mxu1 %v4547_v1 }
 0x7e4   :  { %4220 = vmatprep.subr.mxu1 %v4595_v12 }
 0x87e   :  { %v1220_v60 = vpop.f32.mrf.mxu0  ;;  %v1168_v61 = vpop.f32.mrf.mxu1 }
 0x880   :  { %v4160_v62 = vpop.f32.mrf.mxu0  ;;  %v4152_v63 = vpop.f32.mrf.mxu1 }
 0x882   :  { %v1223_v2 = vpop.f32.mrf.mxu0  ;;  %v1171_v3 = vpop.f32.mrf.mxu1 }
 0x883   :  { %v4485_v4 = vpack.i.bf16 %v1223_v2, %v1220_v60 }
 0x884   :  { %v4161_v5 = vpop.f32.mrf.mxu0  ;;  %v4153_v6 = vpop.f32.mrf.mxu1 }
 0x885   :  { %4486 = vrot.lane.b32.xlu0 %v4485_v4, %s4594_s14  ;;  %v1717_v4 = vld [vmem:[%s3590_s26 + $0x8] sm:$0xff]  ;;  %v1716_v6 = vld [vmem:[%s3590_s26] sm:$0xff]  ;;  %s3597_s26 = sld [smem:[%s5198_s0 + %s4615_s23]]   ;;  %s4623_s23 = smov 32  }
 0x886   :  { %v1324_v7 = vpop.f32.mrf.mxu0  ;;  %v1272_v8 = vpop.f32.mrf.mxu1  ;;  %s3610_s12 = sld [smem:[%s5198_s0 + %s4623_s23]]  }
 0x888   :  { %v4176_v9 = vpop.f32.mrf.mxu0  ;;  %v4168_v10 = vpop.f32.mrf.mxu1 }
 0x88a   :  { %v1327_v11 = vpop.f32.mrf.mxu0  ;;  %v1275_v13 = vpop.f32.mrf.mxu1 }
 0x88b   :  { %v4480_v14 = vpack.i.bf16 %v1327_v11, %v1324_v7 }
 0x88c   :  { %v4177_v16 = vpop.f32.mrf.mxu0  ;;  %v4169_v18 = vpop.f32.mrf.mxu1 }
 0x88d   :  { %4481 = vrot.lane.b32.xlu1 %v4480_v14, %s4594_s14  ;;  %v1792_v16 = vld [vmem:[%s3591_s1 + $0x8] sm:$0xff] }
 0x8f7   :  { %v4487_v19 = vpop.permute.xlu0 %4486 }
 0x8f8   :  { %v4489_v22 = vunpack.i.h.bf16 %v4487_v19  ;;  %v4488_v23 = vunpack.i.l.bf16 %v4487_v19 }
 0x8fa   :  { %v1347_v27 = vsel %vm197_vm0, %v1168_v61, %v4488_v23  ;;  %v1348_v28 = vsel %vm197_vm0, %v1171_v3, %v4489_v22 }
 0x8fb   :  { %v1351_v32 = vpack.c.bf16 %v1348_v28, %v1347_v27 }
 0x8ff   :  { %v4482_v24 = vpop.permute.xlu1 %4481 }
 0x900   :  { %v4484_v25 = vunpack.i.h.bf16 %v4482_v24  ;;  %v4483_v26 = vunpack.i.l.bf16 %v4482_v24 }
 0x902   :  { %v1349_v29 = vsel %vm197_vm0, %v1272_v8, %v4483_v26  ;;  %v1350_v30 = vsel %vm197_vm0, %v1275_v13, %v4484_v25  ;;  %v1791_v13 = vld [vmem:[%s3591_s1] sm:$0xff]  ;;  %s3598_s1 = sld [smem:[%s5198_s0 + %s4617_s28]]   ;;  %s4625_s28 = smov 96  }
 0x903   :  { %v1352_v31 = vpack.c.bf16 %v1350_v30, %v1349_v29 }
 0x905   :  { %1513 = vmatprep.mubr.bf16.mxu1 %v1352_v31 }
 0x906   :  { %1514 = vmatmul.mubr.bf16.vlgmr.msra.gmra.mxu1 %v1351_v32 }
 0x907   :  { %4224 = vmatprep.mubr.msk.f32.mxu1 %vm4596_vm1, %v4595_v12  ;;  %4221 = vmatpush3.msra.mxu1 %v1717_v4 }
 0x908   :  { %4222 = vmatprep.subr.mxu1 %v4595_v12 }
 0x909   :  { %4223 = vmatpush3.msra.mxu1 %v1716_v6 }
 0x9c6   :  { %v3883_v33 = vpop.f32.mrf.mxu1 }
 0x9c8   :  { %v3884_v20 = vpop.f32.mrf.mxu1 }
 0x9c9   :  { %v4867_v34 = vadd.f32 %v3884_v20, %v3883_v33 }
 0x9ca   :  { %v3886_v35 = vpop.f32.mrf.mxu1 }
 0x9cb   :  { %v1522_v15 = vmul.f32 %v4867_v34, %v4867_v34 }
 0x9cc   :  { %v3887_v36 = vpop.f32.mrf.mxu1 }
 0x9cd   :  { %v4871_v37 = vadd.f32 %v3887_v36, %v3886_v35  ;;  %1526 = vrot.lane.b32.xlu0 %v1522_v15, %s4594_s14 }
 0x9cf   :  { %v1523_v21 = vmul.f32 %v4871_v37, %v4871_v37 }
 0x9d1   :  { %1528 = vrot.lane.b32.xlu1 %v1523_v21, %s4594_s14  ;;  %v3713_v21 = vld [vmem:[%s3593_s9 + $0xc] sm:$0xf] }
 0xa3f   :  { %v1527_v38 = vpop.permute.xlu0 %1526 }
 0xa40   :  { %v1532_v41 = vsel %vm197_vm0, %v4867_v34, %v1527_v38  ;;  %v3711_v38 = vld [vmem:[%s3593_s9 + $0x8] sm:$0xf] }
 0xa43   :  { %v1529_v39 = vpop.permute.xlu1 %1528 }
 0xa44   :  { %v1533_v17 = vsel %vm197_vm0, %v4871_v37, %v1529_v39  ;;  %v4548_v39 = vld [vmem:[%s3594_s13 + $0x78] sm:$0xff]  }
 0xa45   :  { %4179 = vmatpush3.msra.mxu0 %v1533_v17  ;;  %v4549_v17 = vld [vmem:[%s3594_s13 + $0x38] sm:$0xff]  }
 0xa46   :  { %4180 = vmatprep.subr.mxu0 %v4595_v12 }
 0xa47   :  { %4181 = vmatpush3.msra.mxu0 %v1532_v41  ;;  %v4551_v41 = vld [vmem:[%s3594_s13 + $0x30] sm:$0xff]  }
 0xa48   :  { %4183 = vmatmul.mubr.msk.f32.vlgmr.msra.gmra.mxu0 %vm1535_vm11, %v1534_v40  ;;  %4185 = vmatprep.subr.mxu0 %v4595_v12  ;;  %v4550_v40 = vld [vmem:[%s3594_s13 + $0x70] sm:$0xff]  }
 0xa49   :  { %4186 = vmatpush3.msra.mxu0 %v1624_v42  ;;  %4217 = vmatprep.mubr.msk.f32.mxu0 %vm4596_vm1, %v4595_v12  ;;  %v4552_v42 = vld [vmem:[%s3594_s13 + $0x68] sm:$0xff]  }
 0xa4a   :  { %4187 = vmatprep.subr.mxu0 %v4595_v12 }
 0xa4b   :  { %4188 = vmatpush3.msra.mxu0 %v1623_v43  ;;  %v4553_v43 = vld [vmem:[%s3594_s13 + $0x28] sm:$0xff]  }
 0xa4c   :  { %4189 = vmatprep.subr.mxu0 %v4595_v12 }
 0xa4d   :  { %4190 = vmatpush3.msra.mxu0 %v1622_v44  ;;  %v4554_v44 = vld [vmem:[%s3594_s13 + $0x60] sm:$0xff]  }
 0xa4e   :  { %4191 = vmatprep.subr.mxu0 %v4595_v12 }
 0xa4f   :  { %4192 = vmatpush3.msra.mxu0 %v1621_v45  ;;  %v4555_v45 = vld [vmem:[%s3594_s13 + $0x20] sm:$0xff]  }
 0xa50   :  { %4193 = vmatprep.subr.mxu0 %v4595_v12 }
 0xa51   :  { %4194 = vmatpush3.msra.mxu0 %v1620_v46  ;;  %v4556_v46 = vld [vmem:[%s3594_s13 + $0x58] sm:$0xff]  }
 0xa52   :  { %4195 = vmatprep.subr.mxu0 %v4595_v12 }
 0xa53   :  { %4196 = vmatpush3.msra.mxu0 %v1619_v47  ;;  %v4557_v47 = vld [vmem:[%s3594_s13 + $0x18] sm:$0xff]  }
 0xa54   :  { %4197 = vmatprep.subr.mxu0 %v4595_v12 }
 0xa55   :  { %4198 = vmatpush3.msra.mxu0 %v1618_v48  ;;  %v4558_v48 = vld [vmem:[%s3594_s13 + $0x50] sm:$0xff]  }
 0xa56   :  { %4199 = vmatprep.subr.mxu0 %v4595_v12 }
 0xa57   :  { %4200 = vmatpush3.msra.mxu0 %v1617_v49  ;;  %v4559_v49 = vld [vmem:[%s3594_s13 + $0x10] sm:$0xff]  }
 0xa58   :  { %4201 = vmatprep.subr.mxu0 %v4595_v12 }
 0xa59   :  { %4202 = vmatpush3.msra.mxu0 %v1616_v50  ;;  %v4560_v50 = vld [vmem:[%s3594_s13 + $0x48] sm:$0xff]  }
 0xa5a   :  { %4203 = vmatprep.subr.mxu0 %v4595_v12 }
 0xa5b   :  { %4204 = vmatpush3.msra.mxu0 %v1615_v51  ;;  %v4561_v51 = vld [vmem:[%s3594_s13 + $0x8] sm:$0xff]  }
 0xa5c   :  { %4205 = vmatprep.subr.mxu0 %v4595_v12 }
 0xa5d   :  { %4206 = vmatpush3.msra.mxu0 %v1614_v52  ;;  %v4562_v52 = vld [vmem:[%s3594_s13 + $0x40] sm:$0xff]  }
 0xa5e   :  { %4207 = vmatprep.subr.mxu0 %v4595_v12 }
 0xa5f   :  { %4208 = vmatpush3.msra.mxu0 %v1613_v53  ;;  %v4563_v53 = vld [vmem:[%s3594_s13] sm:$0xff]  }
 0xa60   :  { %4209 = vmatprep.subr.mxu0 %v4595_v12 }
 0xa61   :  { %4210 = vmatpush3.msra.mxu0 %v1612_v54 }
 0xa62   :  { %4211 = vmatprep.subr.mxu0 %v4595_v12 }
 0xa63   :  { %4212 = vmatpush3.msra.mxu0 %v1611_v55 }
 0xa64   :  { %4213 = vmatprep.subr.mxu0 %v4595_v12 }
 0xa65   :  { %4214 = vmatpush3.msra.mxu0 %v1610_v56 }
 0xa66   :  { %4215 = vmatprep.subr.mxu0 %v4595_v12 }
 0xa67   :  { %4216 = vmatpush3.msra.mxu0 %v1609_v57 }
 0xa68   :  { %4232 = vmatprep.subr.bf16.mxu0 %v4595_v12 }
 0xb08   :  { %v1605_v58 = vpop.f32.mrf.mxu0 }
 0xb09   :  { %4218 = vmatmul.mubr.f32.vlgmr.msra.gmra.mxu0 %v1605_v58 }
 0xb0a   :  { %v4184_v59 = vpop.f32.mrf.mxu0  ;;  %4234 = vmatprep.mubr.msk.bf16.mxu0 %vm4596_vm1, %v4595_v12 }
 0xbc9   :  { %v1691_v60 = vpop.f32.mrf.mxu0 }
 0xbca   :  { %v1695_v61 = vmul.f32 0.015625, %v1691_v60 }
 0xbcb   :  { %v4219_v62 = vpop.f32.mrf.mxu0 }
 0xbcc   :  { %v1696_v63 = vmul.f32 %v1695_v61, %v1695_v61  ;;  %v1705_v7 = vsub.f32 0.0, %v1695_v61 }
 0xbce   :  { %1698 = vrot.lane.b32.xlu1 %v1696_v63, %s4602_s2 }
 0xc40   :  { %v1699_v0 = vpop.permute.xlu1 %1698 }
 0xc41   :  { %v1701_v1 = vsub.f32 %v1695_v61, %v1699_v0 }
 0xc43   :  { %v1702_v2 = vmax.f32 %v1701_v1, 0.0 }
 0xc45   :  { %v1703_v3 = vadd.f32 1e-05, %v1702_v2 }
 0xc47   :  { %4582 = vrsqrt.f32 %v1703_v3 }
 0xc54   :  { %v4583_v5 = vpop.eup %4582 }
 0xc55   :  { %1707 = vrot.lane.b32.xlu0 %v4583_v5, %s4608_s27  ;;  %s4616_s27 = smov 112  }
 0xcc7   :  { %v1708_v8 = vpop.permute.xlu0 %1707 }
 0xcc8   :  { %v1710_v9 = vmul.f32 %v1708_v8, %v1705_v7 }
 0xcca   :  { %1712 = vrot.lane.b32.xlu1 %v1710_v9, %s4602_s2  ;;  %s4610_s2 = smov 14  }
 0xccb   :  { %s3592_s5 = sld [smem:[%s5198_s0 + %s4610_s2]]   ;;  %s4618_s2 = smov 21  }
 0xcd1   :  { %v3706_v24 = vld [vmem:[%s3592_s5] ss:$0 sm:$0xff]  ;;  %v3707_v28 = vld [vmem:[%s3592_s5 + $0x1] ss:$0 sm:$0xff]  ;;  %s3599_s5 = sld [smem:[%s5198_s0 + %s4618_s2]]  }
 0xcd2   :  { %s3605_s2 = sld [smem:[%s5198_s0 + %s4626_s29]]  }
 0xd3c   :  { %v1713_v10 = vpop.permute.xlu1 %1712 }
 0xd3d   :  { %v1715_v11 = vsel %vm892_vm4, %v1708_v8, %v1713_v10 }
 0xd3e   :  { %4225 = vmatmul.mubr.msk.f32.vlgmr.msra.gmra.mxu1 %vm1535_vm11, %v1715_v11 }
 0xd3f   :  { %4229 = vmatprep.mubr.msk.f32.mxu1 %vm970_vm5, %v1791_v13 }
 0xdfe   :  { %v1787_v14 = vpop.f32.mrf.mxu1 }
 0xdff   :  { %4227 = vmatprep.subr.msk.mxu1 %vm983_vm6, %v1787_v14 }
 0xe00   :  { %v4226_v18 = vpop.f32.mrf.mxu1  ;;  %4228 = vmatpush3.msk.msra.mxu1 %vm983_vm6, %v1787_v14 }
 0xe01   :  { %4230 = vmatmul.mubr.msk.f32.vlgmr.msra.gmra.mxu1 %vm970_vm5, %v1792_v16  ;;  %4238 = vmatprep.subr.bf16.mxu1 %v4595_v12 }
 0xe02   :  { %4240 = vmatprep.mubr.msk.bf16.mxu1 %vm4596_vm1, %v4595_v12 }
 0xec1   :  { %v4231_v19 = vpop.f32.mrf.mxu1 }
 0xec2   :  { %1883 = vrot.lane.b32.xlu1 %v4231_v19, %s4594_s14  ;;  %v1878_v23 = vmul.f32 %v4231_v19, %v4871_v37  ;;  %v1908_v37 = vld [vmem:[%s3593_s9] sm:$0xf] }
 0xec3   :  { %v1868_v22 = vpop.f32.mrf.mxu1 }
 0xec4   :  { %1881 = vrot.lane.b32.xlu0 %v1868_v22, %s4594_s14  ;;  %v1877_v26 = vmul.f32 %v4867_v34, %v1868_v22  ;;  %v3709_v34 = vld [vmem:[%s3593_s9 + $0x4] sm:$0xf]  ;;  %s3600_s9 = sld [smem:[%s5198_s0 + %s4619_s6]]  }
 0xec5   :  { %s3606_s6 = sld [smem:[%s5198_s0 + %s4627_s3]]  }
 0xec6   :  { %s3613_s3 = sld [smem:[%s5198_s0 + %s4633_s30]]  }
 0xf34   :  { %v1884_v25 = vpop.permute.xlu1 %1883 }
 0xf35   :  { %v1888_v27 = vadd.f32 %v1884_v25, %v1878_v23 }
 0xf36   :  { %v1882_v29 = vpop.permute.xlu0 %1881 }
 0xf37   :  { %v1895_v30 = vadd.f32 %v3706_v24, %v1888_v27  ;;  %v1887_v31 = vadd.f32 %v1882_v29, %v1877_v26  ;;  %v2273_v26 = vld [vmem:[%s3595_s18] sm:$0x3]  ;;  %v2361_v29 = vld [vmem:[%s4990_s22 + $0x70] sm:$0xff]  ;;  %s3602_s18 = sld [smem:[%s5198_s0 + %s4621_s15]]  }
 0xf39   :  { %v1904_v32 = vmul.f32 %v3707_v28, %v1895_v30  ;;  %v1894_v33 = vadd.f32 %v3706_v24, %v1887_v31  ;;  %vm1897_vm12 = vcmp.gt.f32.partialorder %v1895_v30, 0.0  ;;  %v2359_v31 = vld [vmem:[%s4990_s22 + $0x60] sm:$0xff] }
 0xf3b   :  { %vm1896_vm13 = vcmp.gt.f32.partialorder %v1894_v33, 0.0  ;;  %v1903_v20 = vmul.f32 %v3707_v28, %v1894_v33  ;;  %v1906_v35 = vsel %vm1897_vm12, %v1895_v30, %v1904_v32  ;;  %v2362_v28 = vld [vmem:[%s4990_s22 + $0x78] sm:$0xff]  ;;  %v2360_v30 = vld [vmem:[%s4990_s22 + $0x68] sm:$0xff] }
 0xf3c   :  { %v2358_v32 = vld [vmem:[%s4990_s22 + $0x58] sm:$0xff] }
 0xf3d   :  { %v1905_v15 = vsel %vm1896_vm13, %v1894_v33, %v1903_v20  ;;  %v2357_v33 = vld [vmem:[%s4990_s22 + $0x50] sm:$0xff]  ;;  %v2356_v20 = vld [vmem:[%s4990_s22 + $0x48] sm:$0xff] }
 0xf3e   :  { %v1907_v36 = vpack.c.bf16 %v1906_v35, %v1905_v15  ;;  %v2355_v35 = vld [vmem:[%s4990_s22 + $0x40] sm:$0xff]  ;;  %v2354_v15 = vld [vmem:[%s4990_s22 + $0x38] sm:$0xff] }
 0xf40   :  { %4233 = vmatpush3.bf16.msra.mxu0 %v1907_v36  ;;  %4239 = vmatpush3.bf16.msra.mxu1 %v1907_v36 }
 0xf41   :  { %4244 = vmatprep.subr.bf16.mxu0 %v4595_v12  ;;  %4250 = vmatprep.subr.bf16.mxu1 %v4595_v12 }
 0xf43   :  { %4241 = vmatmul.mubr.msk.bf16.vlgmr.msra.gmra.mxu1 %vm1535_vm11, %v3709_v34  ;;  %4235 = vmatmul.mubr.msk.bf16.vlgmr.msra.gmra.mxu0 %vm1535_vm11, %v1908_v37  ;;  %v2352_v34 = vld [vmem:[%s4990_s22 + $0x28] sm:$0xff]  ;;  %v2351_v37 = vld [vmem:[%s4990_s22 + $0x20] sm:$0xff] }
 0xf44   :  { %4245 = vmatpush3.bf16.msra.mxu0 %v1907_v36  ;;  %4251 = vmatpush3.bf16.msra.mxu1 %v1907_v36  ;;  %v2353_v36 = vld [vmem:[%s4990_s22 + $0x30] sm:$0xff] }
 0xf45   :  { %4252 = vmatprep.mubr.msk.bf16.mxu1 %vm4596_vm1, %v4595_v12  ;;  %4246 = vmatprep.mubr.msk.bf16.mxu0 %vm4596_vm1, %v4595_v12 }
 0xf46   :  { %4256 = vmatprep.subr.mxu1 %v4595_v12  ;;  %3923 = vmatprep.subr.bf16.mxu0 %v4548_v39  ;;  %v2348_v39 = vld [vmem:[%s4990_s22 + $0x8] sm:$0xff] }
 0xf4b   :  { %4253 = vmatmul.mubr.msk.bf16.vlgmr.msra.gmra.mxu1 %vm1535_vm11, %v3713_v21  ;;  %4247 = vmatmul.mubr.msk.bf16.vlgmr.msra.gmra.mxu0 %vm1535_vm11, %v3711_v38  ;;  %v2350_v21 = vld [vmem:[%s4990_s22 + $0x18] sm:$0xff]  ;;  %v2349_v38 = vld [vmem:[%s4990_s22 + $0x10] sm:$0xff] }
 0xf4c   :  { %4258 = vmatprep.mubr.msk.f32.mxu1 %vm4596_vm1, %v4595_v12  ;;  %3924 = vmatpush3.bf16.msra.mxu0 %v4549_v17  ;;  %v2347_v17 = vld [vmem:[%s4990_s22] sm:$0xff]  ;;  %s5095_s22 = sld [smem:[%s5198_s0 + %s4622_s19]]  }
 0xf4d   :  { %3925 = vmatprep.subr.bf16.mxu0 %v4550_v40 }
 0xf50   :  { %3926 = vmatpush3.bf16.msra.mxu0 %v4551_v41 }
 0xf51   :  { %3927 = vmatprep.subr.bf16.mxu0 %v4552_v42 }
 0xf54   :  { %3928 = vmatpush3.bf16.msra.mxu0 %v4553_v43 }
 0xf55   :  { %3929 = vmatprep.subr.bf16.mxu0 %v4554_v44 }
 0xf58   :  { %3930 = vmatpush3.bf16.msra.mxu0 %v4555_v45 }
 0xf59   :  { %3931 = vmatprep.subr.bf16.mxu0 %v4556_v46 }
 0xf5c   :  { %3932 = vmatpush3.bf16.msra.mxu0 %v4557_v47 }
 0xf5d   :  { %3933 = vmatprep.subr.bf16.mxu0 %v4558_v48 }
 0xf60   :  { %3934 = vmatpush3.bf16.msra.mxu0 %v4559_v49 }
 0xf61   :  { %3935 = vmatprep.subr.bf16.mxu0 %v4560_v50  ;;  %v2457_v50 = vld [vmem:[%s3597_s26 + $0x18] sm:$0xff] }
 0xf64   :  { %3936 = vmatpush3.bf16.msra.mxu0 %v4561_v51  ;;  %v2456_v51 = vld [vmem:[%s3597_s26 + $0x10] sm:$0xff] }
 0xf65   :  { %3937 = vmatprep.subr.bf16.mxu0 %v4562_v52  ;;  %v2455_v52 = vld [vmem:[%s3597_s26 + $0x8] sm:$0xff] }
 0xf68   :  { %3938 = vmatpush3.bf16.msra.mxu0 %v4563_v53 }
 0xf69   :  { %4296 = vmatprep.subr.mxu0 %v4595_v12 }
0x1003   :  { %v1991_v54 = vpop.f32.mrf.mxu1  ;;  %v1946_v55 = vpop.f32.mrf.mxu0 }
0x1005   :  { %v4242_v56 = vpop.f32.mrf.mxu1  ;;  %v4236_v57 = vpop.f32.mrf.mxu0 }
0x1007   :  { %v1994_v58 = vpop.f32.mrf.mxu1  ;;  %v1949_v59 = vpop.f32.mrf.mxu0 }
0x1009   :  { %v4243_v60 = vpop.f32.mrf.mxu1  ;;  %v4237_v61 = vpop.f32.mrf.mxu0 }
0x100a   :  { %v2531_v60 = vld [vmem:[%s3598_s1] sm:$0xff] }
0x100b   :  { %v2081_v62 = vpop.f32.mrf.mxu1  ;;  %v2036_v63 = vpop.f32.mrf.mxu0 }
0x100c   :  { %v4490_v0 = vpack.i.bf16 %v1991_v54, %v2081_v62  ;;  %v2454_v54 = vld [vmem:[%s3597_s26] sm:$0xff]  ;;  %s4632_s26 = smov 31  }
0x100d   :  { %v4254_v1 = vpop.f32.mrf.mxu1  ;;  %v4248_v2 = vpop.f32.mrf.mxu0  ;;  %s3609_s29 = sld [smem:[%s5198_s0 + %s4632_s26]]  }
0x100e   :  { %4491 = vrot.lane.b32.xlu0 %v4490_v0, %s4594_s14  ;;  %v3735_v2 = vld [vmem:[%s3599_s5] ss:$0 sm:$0xff] }
0x100f   :  { %v2084_v3 = vpop.f32.mrf.mxu1  ;;  %v2039_v4 = vpop.f32.mrf.mxu0 }
0x1011   :  { %v4255_v5 = vpop.f32.mrf.mxu1  ;;  %v4249_v6 = vpop.f32.mrf.mxu0 }
0x1012   :  { %v3736_v5 = vld [vmem:[%s3599_s5 + $0x1] ss:$0 sm:$0xff] }
0x1080   :  { %v4492_v7 = vpop.permute.xlu0 %4491 }
0x1081   :  { %v4494_v8 = vunpack.i.h.bf16 %v4492_v7  ;;  %v4493_v9 = vunpack.i.l.bf16 %v4492_v7 }
0x1083   :  { %v2095_v10 = vsel %vm197_vm0, %v1946_v55, %v4494_v8  ;;  %v2096_v11 = vsel %vm197_vm0, %v2036_v63, %v4493_v9 }
0x1084   :  { %v2097_v13 = vpack.c.bf16 %v2095_v10, %v2095_v10  ;;  %v2098_v14 = vpack.c.bf16 %v2096_v11, %v2096_v11  ;;  %v3738_v11 = vld [vmem:[%s3600_s9 + $0x2] sm:$0x3] }
0x1086   :  { %2259 = vmatprep.mubr.bf16.mxu0 %v2098_v14  ;;  %v3742_v14 = vld [vmem:[%s3600_s9 + $0x6] sm:$0x3] }
0x1087   :  { %2260 = vmatmul.mubr.bf16.vlgmr.msra.gmra.mxu0 %v2097_v13  ;;  %v2629_v13 = vld [vmem:[%s3600_s9] sm:$0x3] }
0x1088   :  { %4304 = vmatprep.mubr.msk.f32.mxu0 %vm4596_vm1, %v4595_v12  ;;  %4297 = vmatpush3.msra.mxu0 %v2457_v50 }
0x1089   :  { %4298 = vmatprep.subr.mxu0 %v4595_v12 }
0x108a   :  { %4299 = vmatpush3.msra.mxu0 %v2456_v51 }
0x108b   :  { %4300 = vmatprep.subr.mxu0 %v4595_v12 }
0x108c   :  { %4301 = vmatpush3.msra.mxu0 %v2455_v52 }
0x108d   :  { %4302 = vmatprep.subr.mxu0 %v4595_v12 }
0x108e   :  { %4303 = vmatpush3.msra.mxu0 %v2454_v54 }
0x108f   :  { %4307 = vmatprep.subr.mxu0 %v4595_v12 }
0x1147   :  { %v3939_v16 = vpop.f32.mrf.mxu0 }
0x1149   :  { %v3940_v18 = vpop.f32.mrf.mxu0 }
0x114a   :  { %v4979_v19 = vadd.f32 %v3940_v18, %v3939_v16  ;;  %v3740_v16 = vld [vmem:[%s3600_s9 + $0x4] sm:$0x3] }
0x114b   :  { %v3942_v22 = vpop.f32.mrf.mxu0 }
0x114c   :  { %v2267_v23 = vmul.f32 %v4979_v19, %v4979_v19 }
0x114d   :  { %v3943_v24 = vpop.f32.mrf.mxu0 }
0x114e   :  { %2269 = vrot.lane.b32.xlu1 %v2267_v23, %s4594_s14 }
0x11c0   :  { %v2270_v25 = vpop.permute.xlu1 %2269 }
0x11c1   :  { %v2272_v27 = vsel %vm197_vm0, %v4979_v19, %v2270_v25 }
0x11c2   :  { %4257 = vmatpush3.msra.mxu1 %v2272_v27 }
0x11c3   :  { %4259 = vmatmul.mubr.msk.f32.vlgmr.msra.gmra.mxu1 %vm892_vm4, %v2273_v26  ;;  %4261 = vmatprep.subr.mxu1 %v4595_v12 }
0x11c4   :  { %4262 = vmatpush3.msra.mxu1 %v2362_v28  ;;  %4293 = vmatprep.mubr.msk.f32.mxu1 %vm4596_vm1, %v4595_v12 }
0x11c5   :  { %4263 = vmatprep.subr.mxu1 %v4595_v12 }
0x11c6   :  { %4264 = vmatpush3.msra.mxu1 %v2361_v29 }
0x11c7   :  { %4265 = vmatprep.subr.mxu1 %v4595_v12 }
0x11c8   :  { %4266 = vmatpush3.msra.mxu1 %v2360_v30 }
0x11c9   :  { %4267 = vmatprep.subr.mxu1 %v4595_v12 }
0x11ca   :  { %4268 = vmatpush3.msra.mxu1 %v2359_v31 }
0x11cb   :  { %4269 = vmatprep.subr.mxu1 %v4595_v12 }
0x11cc   :  { %4270 = vmatpush3.msra.mxu1 %v2358_v32 }
0x11cd   :  { %4271 = vmatprep.subr.mxu1 %v4595_v12 }
0x11ce   :  { %4272 = vmatpush3.msra.mxu1 %v2357_v33 }
0x11cf   :  { %4273 = vmatprep.subr.mxu1 %v4595_v12 }
0x11d0   :  { %4274 = vmatpush3.msra.mxu1 %v2356_v20 }
0x11d1   :  { %4275 = vmatprep.subr.mxu1 %v4595_v12 }
0x11d2   :  { %4276 = vmatpush3.msra.mxu1 %v2355_v35 }
0x11d3   :  { %4277 = vmatprep.subr.mxu1 %v4595_v12 }
0x11d4   :  { %4278 = vmatpush3.msra.mxu1 %v2354_v15 }
0x11d5   :  { %4279 = vmatprep.subr.mxu1 %v4595_v12 }
0x11d6   :  { %4280 = vmatpush3.msra.mxu1 %v2353_v36 }
0x11d7   :  { %4281 = vmatprep.subr.mxu1 %v4595_v12 }
0x11d8   :  { %4282 = vmatpush3.msra.mxu1 %v2352_v34 }
0x11d9   :  { %4283 = vmatprep.subr.mxu1 %v4595_v12 }
0x11da   :  { %4284 = vmatpush3.msra.mxu1 %v2351_v37 }
0x11db   :  { %4285 = vmatprep.subr.mxu1 %v4595_v12 }
0x11dc   :  { %4286 = vmatpush3.msra.mxu1 %v2350_v21 }
0x11dd   :  { %4287 = vmatprep.subr.mxu1 %v4595_v12 }
0x11de   :  { %4288 = vmatpush3.msra.mxu1 %v2349_v38 }
0x11df   :  { %4289 = vmatprep.subr.mxu1 %v4595_v12 }
0x11e0   :  { %4290 = vmatpush3.msra.mxu1 %v2348_v39 }
0x11e1   :  { %4291 = vmatprep.subr.mxu1 %v4595_v12 }
0x11e2   :  { %4292 = vmatpush3.msra.mxu1 %v2347_v17 }
0x11e3   :  { %4312 = vmatprep.subr.bf16.mxu1 %v4595_v12 }
0x1283   :  { %v2343_v40 = vpop.f32.mrf.mxu1 }
0x1284   :  { %4294 = vmatmul.mubr.f32.vlgmr.msra.gmra.mxu1 %v2343_v40 }
0x1285   :  { %v4260_v41 = vpop.f32.mrf.mxu1  ;;  %4314 = vmatprep.mubr.msk.bf16.mxu1 %vm4596_vm1, %v4595_v12 }
0x1344   :  { %v2429_v42 = vpop.f32.mrf.mxu1 }
0x1345   :  { %v2433_v43 = vmul.f32 0.0625, %v2429_v42 }
0x1346   :  { %v4295_v44 = vpop.f32.mrf.mxu1 }
0x1347   :  { %v2434_v45 = vmul.f32 %v2433_v43, %v2433_v43  ;;  %v2443_v55 = vsub.f32 0.0, %v2433_v43 }
0x1349   :  { %2436 = vrot.lane.b32.xlu0 %v2434_v45, %s4612_s10 }
0x13bb   :  { %v2437_v46 = vpop.permute.xlu0 %2436 }
0x13bc   :  { %v2439_v47 = vsub.f32 %v2433_v43, %v2437_v46 }
0x13be   :  { %v2440_v48 = vmax.f32 %v2439_v47, 0.0 }
0x13c0   :  { %v2441_v49 = vadd.f32 1e-05, %v2440_v48 }
0x13c2   :  { %4584 = vrsqrt.f32 %v2441_v49 }
0x13cf   :  { %v4585_v53 = vpop.eup %4584 }
0x13d0   :  { %2445 = vrot.lane.b32.xlu1 %v4585_v53, %s4616_s27  ;;  %s3604_s27 = sld [smem:[%s5198_s0 + %s4624_s24]]  }
0x1442   :  { %v2446_v56 = vpop.permute.xlu1 %2445 }
0x1443   :  { %v2448_v57 = vmul.f32 %v2446_v56, %v2443_v55 }
0x1445   :  { %2450 = vrot.lane.b32.xlu0 %v2448_v57, %s4612_s10  ;;  %s4620_s10 = smov 23  }
0x1446   :  { %s3601_s13 = sld [smem:[%s5198_s0 + %s4620_s10]]  }
0x1447   :  { %s3607_s10 = sld [smem:[%s5198_s0 + %s4628_s7]]  }
0x144c   :  { %v4564_v18 = vld [vmem:[%s3601_s13 + $0x78] sm:$0xff]   ;;  %v4566_v22 = vld [vmem:[%s3601_s13 + $0x70] sm:$0xff]   ;;  %v4568_v24 = vld [vmem:[%s3601_s13 + $0x68] sm:$0xff]  }
0x144d   :  { %v4567_v23 = vld [vmem:[%s3601_s13 + $0x30] sm:$0xff]   ;;  %v4569_v25 = vld [vmem:[%s3601_s13 + $0x28] sm:$0xff]   ;;  %v4570_v26 = vld [vmem:[%s3601_s13 + $0x60] sm:$0xff]  }
0x144e   :  { %v4571_v27 = vld [vmem:[%s3601_s13 + $0x20] sm:$0xff]   ;;  %v4572_v28 = vld [vmem:[%s3601_s13 + $0x58] sm:$0xff]   ;;  %v4574_v30 = vld [vmem:[%s3601_s13 + $0x50] sm:$0xff]  }
0x144f   :  { %v4573_v29 = vld [vmem:[%s3601_s13 + $0x18] sm:$0xff]   ;;  %v4575_v31 = vld [vmem:[%s3601_s13 + $0x10] sm:$0xff]   ;;  %v4576_v32 = vld [vmem:[%s3601_s13 + $0x48] sm:$0xff]  }
0x1450   :  { %v4577_v33 = vld [vmem:[%s3601_s13 + $0x8] sm:$0xff]   ;;  %v4578_v20 = vld [vmem:[%s3601_s13 + $0x40] sm:$0xff]  }
0x1451   :  { %v4579_v35 = vld [vmem:[%s3601_s13] sm:$0xff]  }
0x14b7   :  { %v2451_v58 = vpop.permute.xlu0 %2450 }
0x14b8   :  { %v2453_v59 = vsel %vm1535_vm11, %v2446_v56, %v2451_v58 }
0x14b9   :  { %4305 = vmatmul.mubr.msk.f32.vlgmr.msra.gmra.mxu0 %vm709_vm2, %v2453_v59 }
0x14ba   :  { %4309 = vmatprep.mubr.msk.f32.mxu0 %vm4596_vm1, %v4595_v12 }
0x1579   :  { %v2527_v61 = vpop.f32.mrf.mxu0 }
0x157a   :  { %4308 = vmatpush3.msk.msra.mxu0 %vm983_vm6, %v2527_v61 }
0x157b   :  { %v4306_v62 = vpop.f32.mrf.mxu0  ;;  %4310 = vmatmul.mubr.msk.f32.vlgmr.msra.gmra.mxu0 %vm970_vm5, %v2531_v60  ;;  %4318 = vmatprep.subr.bf16.mxu0 %v4595_v12 }
0x157c   :  { %4320 = vmatprep.mubr.msk.bf16.mxu0 %vm4596_vm1, %v4595_v12 }
0x163b   :  { %v2604_v63 = vpop.f32.mrf.mxu0 }
0x163c   :  { %2610 = vrot.lane.b32.xlu1 %v2604_v63, %s4594_s14  ;;  %v2608_v1 = vmul.f32 %v4979_v19, %v2604_v63  ;;  %v4565_v19 = vld [vmem:[%s3601_s13 + $0x38] sm:$0xff]   ;;  %v2998_v63 = vld [vmem:[%s3602_s18] sm:$0x3]  ;;  %s4629_s13 = smov 33   ;;  %s4630_s18 = smov 34  }
0x163d   :  { %v4311_v0 = vpop.f32.mrf.mxu0  ;;  %s3611_s17 = sld [smem:[%s5198_s0 + %s4629_s13]]  }
0x163e   :  { %s3612_s21 = sld [smem:[%s5198_s0 + %s4630_s18]]  }
0x16ae   :  { %v2611_v3 = vpop.permute.xlu1 %2610 }
0x16af   :  { %v2613_v4 = vadd.f32 %v2611_v3, %v2608_v1  ;;  %v3090_v1 = vld [vmem:[%s5095_s22 + $0x78] sm:$0xff]  ;;  %v3088_v3 = vld [vmem:[%s5095_s22 + $0x68] sm:$0xff] }
0x16b1   :  { %v2619_v6 = vadd.f32 %v3735_v2, %v2613_v4  ;;  %v3089_v2 = vld [vmem:[%s5095_s22 + $0x70] sm:$0xff]  ;;  %v3087_v4 = vld [vmem:[%s5095_s22 + $0x60] sm:$0xff] }
0x16b3   :  { %vm2620_vm14 = vcmp.gt.f32.partialorder %v2619_v6, 0.0  ;;  %v2626_v7 = vmul.f32 %v3736_v5, %v2619_v6  ;;  %v3086_v5 = vld [vmem:[%s5095_s22 + $0x58] sm:$0xff] }
0x16b5   :  { %v2627_v8 = vsel %vm2620_vm14, %v2619_v6, %v2626_v7  ;;  %v3085_v6 = vld [vmem:[%s5095_s22 + $0x50] sm:$0xff]  ;;  %v3084_v7 = vld [vmem:[%s5095_s22 + $0x48] sm:$0xff] }
0x16b6   :  { %v2628_v9 = vpack.c.bf16 %v2627_v8, %v2627_v8  ;;  %v3083_v8 = vld [vmem:[%s5095_s22 + $0x40] sm:$0xff] }
0x16b8   :  { %v2635_v10 = vsel %vm2633_vm15, %v2628_v9, 0  ;;  %v3082_v9 = vld [vmem:[%s5095_s22 + $0x38] sm:$0xff] }
0x16b9   :  { %4313 = vmatpush3.bf16.msra.mxu1 %v2635_v10  ;;  %4319 = vmatpush3.bf16.msra.mxu0 %v2635_v10 }
0x16ba   :  { %4324 = vmatprep.subr.bf16.mxu1 %v4595_v12  ;;  %4330 = vmatprep.subr.bf16.mxu0 %v4595_v12 }
0x16bc   :  { %4321 = vmatmul.mubr.msk.bf16.vlgmr.msra.gmra.mxu0 %vm892_vm4, %v3738_v11  ;;  %4315 = vmatmul.mubr.msk.bf16.vlgmr.msra.gmra.mxu1 %vm892_vm4, %v2629_v13  ;;  %v3080_v11 = vld [vmem:[%s5095_s22 + $0x28] sm:$0xff]  ;;  %v3079_v13 = vld [vmem:[%s5095_s22 + $0x20] sm:$0xff] }
0x16bd   :  { %4325 = vmatpush3.bf16.msra.mxu1 %v2635_v10  ;;  %4331 = vmatpush3.bf16.msra.mxu0 %v2635_v10  ;;  %v3081_v10 = vld [vmem:[%s5095_s22 + $0x30] sm:$0xff] }
0x16be   :  { %4332 = vmatprep.mubr.msk.bf16.mxu0 %vm4596_vm1, %v4595_v12  ;;  %4326 = vmatprep.mubr.msk.bf16.mxu1 %vm4596_vm1, %v4595_v12 }
0x16bf   :  { %4336 = vmatprep.subr.mxu0 %v4595_v12  ;;  %3979 = vmatprep.subr.bf16.mxu1 %v4564_v18  ;;  %v3076_v18 = vld [vmem:[%s5095_s22 + $0x8] sm:$0xff] }
0x16c4   :  { %4333 = vmatmul.mubr.msk.bf16.vlgmr.msra.gmra.mxu0 %vm892_vm4, %v3742_v14  ;;  %4327 = vmatmul.mubr.msk.bf16.vlgmr.msra.gmra.mxu1 %vm892_vm4, %v3740_v16  ;;  %v3078_v14 = vld [vmem:[%s5095_s22 + $0x18] sm:$0xff]  ;;  %v3077_v16 = vld [vmem:[%s5095_s22 + $0x10] sm:$0xff]  ;;  %vm3381_vm4 = vcmask 1040384  }
0x16c5   :  { %4338 = vmatprep.mubr.msk.f32.mxu0 %vm4596_vm1, %v4595_v12  ;;  %3980 = vmatpush3.bf16.msra.mxu1 %v4565_v19  ;;  %v3075_v19 = vld [vmem:[%s5095_s22] sm:$0xff]  ;;  %s4631_s22 = smov 30  }
0x16c6   :  { %3981 = vmatprep.subr.bf16.mxu1 %v4566_v22  ;;  %s3608_s25 = sld [smem:[%s5198_s0 + %s4631_s22]]  }
0x16c9   :  { %3982 = vmatpush3.bf16.msra.mxu1 %v4567_v23 }
0x16ca   :  { %3983 = vmatprep.subr.bf16.mxu1 %v4568_v24 }
0x16cd   :  { %3984 = vmatpush3.bf16.msra.mxu1 %v4569_v25 }
0x16ce   :  { %3985 = vmatprep.subr.bf16.mxu1 %v4570_v26 }
0x16d1   :  { %3986 = vmatpush3.bf16.msra.mxu1 %v4571_v27 }
0x16d2   :  { %3987 = vmatprep.subr.bf16.mxu1 %v4572_v28 }
0x16d5   :  { %3988 = vmatpush3.bf16.msra.mxu1 %v4573_v29 }
0x16d6   :  { %3989 = vmatprep.subr.bf16.mxu1 %v4574_v30 }
0x16d9   :  { %3990 = vmatpush3.bf16.msra.mxu1 %v4575_v31 }
0x16da   :  { %3991 = vmatprep.subr.bf16.mxu1 %v4576_v32  ;;  %v3189_v32 = vld [vmem:[%s3604_s27 + $0x38] sm:$0xff] }
0x16dd   :  { %3992 = vmatpush3.bf16.msra.mxu1 %v4577_v33  ;;  %v3188_v33 = vld [vmem:[%s3604_s27 + $0x30] sm:$0xff] }
0x16de   :  { %3993 = vmatprep.subr.bf16.mxu1 %v4578_v20  ;;  %v3187_v20 = vld [vmem:[%s3604_s27 + $0x28] sm:$0xff] }
0x16e1   :  { %3994 = vmatpush3.bf16.msra.mxu1 %v4579_v35 }
0x16e2   :  { %4376 = vmatprep.subr.mxu1 %v4595_v12 }
0x177c   :  { %v2716_v15 = vpop.f32.mrf.mxu0  ;;  %v2671_v36 = vpop.f32.mrf.mxu1 }
0x177e   :  { %v4322_v34 = vpop.f32.mrf.mxu0  ;;  %v4316_v37 = vpop.f32.mrf.mxu1 }
0x177f   :  { %v3184_v34 = vld [vmem:[%s3604_s27 + $0x10] sm:$0xff]  ;;  %v3183_v37 = vld [vmem:[%s3604_s27 + $0x8] sm:$0xff] }
0x1780   :  { %v2719_v21 = vpop.f32.mrf.mxu0  ;;  %v2674_v38 = vpop.f32.mrf.mxu1 }
0x1781   :  { %v3182_v21 = vld [vmem:[%s3604_s27] sm:$0xff] }
0x1782   :  { %v4323_v39 = vpop.f32.mrf.mxu0  ;;  %v4317_v17 = vpop.f32.mrf.mxu1 }
0x1784   :  { %v2806_v40 = vpop.f32.mrf.mxu0  ;;  %v2761_v41 = vpop.f32.mrf.mxu1 }
0x1785   :  { %v4495_v42 = vpack.i.bf16 %v2716_v15, %v2806_v40  ;;  %v3186_v15 = vld [vmem:[%s3604_s27 + $0x20] sm:$0xff] }
0x1786   :  { %v4334_v43 = vpop.f32.mrf.mxu0  ;;  %v4328_v44 = vpop.f32.mrf.mxu1 }
0x1787   :  { %4496 = vrot.lane.b32.xlu0 %v4495_v42, %s4594_s14  ;;  %v3263_v42 = vld [vmem:[%s3605_s2] sm:$0xf] }
0x1788   :  { %v2809_v45 = vpop.f32.mrf.mxu0  ;;  %v2764_v46 = vpop.f32.mrf.mxu1 }
0x178a   :  { %v4335_v47 = vpop.f32.mrf.mxu0  ;;  %v4329_v48 = vpop.f32.mrf.mxu1 }
0x178b   :  { %v3765_v48 = vld [vmem:[%s3606_s6] ss:$0 sm:$0xff] }
0x17f9   :  { %v4497_v49 = vpop.permute.xlu0 %4496 }
0x17fa   :  { %v4499_v50 = vunpack.i.h.bf16 %v4497_v49  ;;  %v4498_v51 = vunpack.i.l.bf16 %v4497_v49 }
0x17fc   :  { %v2820_v52 = vsel %vm197_vm0, %v2671_v36, %v4499_v50  ;;  %v2821_v53 = vsel %vm197_vm0, %v2761_v41, %v4498_v51  ;;  %v3185_v36 = vld [vmem:[%s3604_s27 + $0x18] sm:$0xff]  ;;  %v3766_v51 = vld [vmem:[%s3606_s6 + $0x1] ss:$0 sm:$0xff] }
0x17fd   :  { %v2822_v54 = vpack.c.bf16 %v2820_v52, %v2820_v52  ;;  %v2823_v55 = vpack.c.bf16 %v2821_v53, %v2821_v53  ;;  %v3386_v53 = vld [vmem:[%s3607_s10 + $0x18] sm:$0xff] }
0x17ff   :  { %2984 = vmatprep.mubr.bf16.mxu1 %v2823_v55  ;;  %v3385_v55 = vld [vmem:[%s3607_s10 + $0x10] sm:$0xff] }
0x1800   :  { %2985 = vmatmul.mubr.bf16.vlgmr.msra.gmra.mxu1 %v2822_v54 }
0x1801   :  { %4392 = vmatprep.mubr.msk.f32.mxu1 %vm4596_vm1, %v4595_v12  ;;  %4377 = vmatpush3.msra.mxu1 %v3189_v32 }
0x1802   :  { %4378 = vmatprep.subr.mxu1 %v4595_v12 }
0x1803   :  { %4379 = vmatpush3.msra.mxu1 %v3188_v33 }
0x1804   :  { %4380 = vmatprep.subr.mxu1 %v4595_v12 }
0x1805   :  { %4381 = vmatpush3.msra.mxu1 %v3187_v20 }
0x1806   :  { %4382 = vmatprep.subr.mxu1 %v4595_v12 }
0x1807   :  { %4383 = vmatpush3.msra.mxu1 %v3186_v15 }
0x1808   :  { %4384 = vmatprep.subr.mxu1 %v4595_v12 }
0x1809   :  { %4385 = vmatpush3.msra.mxu1 %v3185_v36 }
0x180a   :  { %4386 = vmatprep.subr.mxu1 %v4595_v12 }
0x180b   :  { %4387 = vmatpush3.msra.mxu1 %v3184_v34 }
0x180c   :  { %4388 = vmatprep.subr.mxu1 %v4595_v12 }
0x180d   :  { %4389 = vmatpush3.msra.mxu1 %v3183_v37 }
0x180e   :  { %4390 = vmatprep.subr.mxu1 %v4595_v12 }
0x180f   :  { %4391 = vmatpush3.msra.mxu1 %v3182_v21 }
0x1810   :  { %4411 = vmatprep.subr.mxu1 %v4595_v12 }
0x18c0   :  { %v3995_v56 = vpop.f32.mrf.mxu1 }
0x18c2   :  { %v3996_v57 = vpop.f32.mrf.mxu1 }
0x18c3   :  { %v5084_v58 = vadd.f32 %v3996_v57, %v3995_v56  ;;  %v3384_v57 = vld [vmem:[%s3607_s10 + $0x8] sm:$0xff] }
0x18c4   :  { %v3998_v59 = vpop.f32.mrf.mxu1 }
0x18c5   :  { %v2992_v60 = vmul.f32 %v5084_v58, %v5084_v58 }
0x18c6   :  { %v3999_v61 = vpop.f32.mrf.mxu1 }
0x18c7   :  { %2994 = vrot.lane.b32.xlu1 %v2992_v60, %s4594_s14 }
0x1939   :  { %v2995_v62 = vpop.permute.xlu1 %2994 }
0x193a   :  { %v2997_v0 = vsel %vm197_vm0, %v5084_v58, %v2995_v62 }
0x193b   :  { %4337 = vmatpush3.msk.msra.mxu0 %vm2633_vm15, %v2997_v0 }
0x193c   :  { %4339 = vmatmul.mubr.msk.f32.vlgmr.msra.gmra.mxu0 %vm889_vm3, %v2998_v63  ;;  %4341 = vmatprep.subr.mxu0 %v4595_v12  ;;  %vm3373_vm3 = vcmask 257026  }
0x193d   :  { %4342 = vmatpush3.msra.mxu0 %v3090_v1  ;;  %4373 = vmatprep.mubr.msk.f32.mxu0 %vm4596_vm1, %v4595_v12 }
0x193e   :  { %4343 = vmatprep.subr.mxu0 %v4595_v12 }
0x193f   :  { %4344 = vmatpush3.msra.mxu0 %v3089_v2 }
0x1940   :  { %4345 = vmatprep.subr.mxu0 %v4595_v12 }
0x1941   :  { %4346 = vmatpush3.msra.mxu0 %v3088_v3 }
0x1942   :  { %4347 = vmatprep.subr.mxu0 %v4595_v12 }
0x1943   :  { %4348 = vmatpush3.msra.mxu0 %v3087_v4 }
0x1944   :  { %4349 = vmatprep.subr.mxu0 %v4595_v12 }
0x1945   :  { %4350 = vmatpush3.msra.mxu0 %v3086_v5 }
0x1946   :  { %4351 = vmatprep.subr.mxu0 %v4595_v12 }
0x1947   :  { %4352 = vmatpush3.msra.mxu0 %v3085_v6 }
0x1948   :  { %4353 = vmatprep.subr.mxu0 %v4595_v12 }
0x1949   :  { %4354 = vmatpush3.msra.mxu0 %v3084_v7 }
0x194a   :  { %4355 = vmatprep.subr.mxu0 %v4595_v12 }
0x194b   :  { %4356 = vmatpush3.msra.mxu0 %v3083_v8 }
0x194c   :  { %4357 = vmatprep.subr.mxu0 %v4595_v12 }
0x194d   :  { %4358 = vmatpush3.msra.mxu0 %v3082_v9 }
0x194e   :  { %4359 = vmatprep.subr.mxu0 %v4595_v12 }
0x194f   :  { %4360 = vmatpush3.msra.mxu0 %v3081_v10 }
0x1950   :  { %4361 = vmatprep.subr.mxu0 %v4595_v12 }
0x1951   :  { %4362 = vmatpush3.msra.mxu0 %v3080_v11 }
0x1952   :  { %4363 = vmatprep.subr.mxu0 %v4595_v12 }
0x1953   :  { %4364 = vmatpush3.msra.mxu0 %v3079_v13  ;;  %v3478_v13 = vld [vmem:[%s3610_s12 + $0x8] sm:$0xff] }
0x1954   :  { %4365 = vmatprep.subr.mxu0 %v4595_v12 }
0x1955   :  { %4366 = vmatpush3.msra.mxu0 %v3078_v14  ;;  %v3477_v14 = vld [vmem:[%s3610_s12] sm:$0xff] }
0x1956   :  { %4367 = vmatprep.subr.mxu0 %v4595_v12 }
0x1957   :  { %4368 = vmatpush3.msra.mxu0 %v3077_v16  ;;  %v76_v16 = vstv %s3611_s17 }
0x1958   :  { %4369 = vmatprep.subr.mxu0 %v4595_v12  ;;  %77 = vst [vmem:[#allocation2] sm:$0x1] %v76_v16 }
0x1959   :  { %4370 = vmatpush3.msra.mxu0 %v3076_v18  ;;  %v78_v18 = vstv %s3612_s21 }
0x195a   :  { %4371 = vmatprep.subr.mxu0 %v4595_v12  ;;  %79 = vst [vmem:[#allocation3] sm:$0x1] %v78_v18 }
0x195b   :  { %4372 = vmatpush3.msra.mxu0 %v3075_v19 }
0x195c   :  { %4395 = vmatprep.subr.mxu0 %v4595_v12 }
0x19fc   :  { %v3071_v22 = vpop.f32.mrf.mxu0 }
0x19fd   :  { %4374 = vmatmul.mubr.f32.vlgmr.msra.gmra.mxu0 %v3071_v22  ;;  %v3769_v22 = vld [vmem:[%s3609_s29] ss:$0 sm:$0xff] }
0x19fe   :  { %v4340_v23 = vpop.f32.mrf.mxu0  ;;  %4397 = vmatprep.mubr.msk.f32.mxu0 %vm4596_vm1, %v4595_v12 }
0x1abd   :  { %v3157_v24 = vpop.f32.mrf.mxu0 }
0x1abe   :  { %v3161_v25 = vmul.f32 0.25, %v3157_v24 }
0x1abf   :  { %v4375_v26 = vpop.f32.mrf.mxu0 }
0x1ac0   :  { %v3162_v27 = vmul.f32 %v3161_v25, %v3161_v25  ;;  %v3171_v38 = vsub.f32 0.0, %v3161_v25 }
0x1ac2   :  { %3164 = vrot.lane.b32.xlu0 %v3162_v27, %s4623_s23  ;;  %v3770_v27 = vld [vmem:[#allocation2] ss:$0 sm:$0xff] }
0x1b34   :  { %v3165_v28 = vpop.permute.xlu0 %3164 }
0x1b35   :  { %v3167_v29 = vsub.f32 %v3161_v25, %v3165_v28 }
0x1b37   :  { %v3168_v30 = vmax.f32 %v3167_v29, 0.0  ;;  %v3772_v29 = vld [vmem:[#allocation3] ss:$0 sm:$0xff] }
0x1b39   :  { %v3169_v31 = vadd.f32 1e-05, %v3168_v30 }
0x1b3b   :  { %4586 = vrsqrt.f32 %v3169_v31 }
0x1b48   :  { %v4587_v35 = vpop.eup %4586 }
0x1b49   :  { %3173 = vrot.lane.b32.xlu1 %v4587_v35, %s4625_s28 }
0x1bbb   :  { %v3174_v39 = vpop.permute.xlu1 %3173 }
0x1bbc   :  { %v3176_v17 = vmul.f32 %v3174_v39, %v3171_v38 }
0x1bbe   :  { %3178 = vrot.lane.b32.xlu0 %v3176_v17, %s4623_s23 }
0x1c30   :  { %v3179_v40 = vpop.permute.xlu0 %3178 }
0x1c31   :  { %v3181_v41 = vsel %vm709_vm2, %v3174_v39, %v3179_v40 }
0x1c32   :  { %4393 = vmatmul.mubr.msk.f32.vlgmr.msra.gmra.mxu1 %vm197_vm0, %v3181_v41 }
0x1c33   :  { %4415 = vmatprep.mubr.msk.f32.mxu1 %vm4596_vm1, %v4595_v12  ;;  %4412 = vmatpush3.msra.mxu1 %v3478_v13 }
0x1c34   :  { %4413 = vmatprep.subr.mxu1 %v4595_v12 }
0x1c35   :  { %4414 = vmatpush3.msra.mxu1 %v3477_v14 }
0x1cf2   :  { %v3259_v43 = vpop.f32.mrf.mxu1 }
0x1cf3   :  { %4396 = vmatpush3.msk.msra.mxu0 %vm983_vm6, %v3259_v43 }
0x1cf4   :  { %v4394_v44 = vpop.f32.mrf.mxu1  ;;  %4398 = vmatmul.mubr.msk.f32.vlgmr.msra.gmra.mxu0 %vm970_vm5, %v3263_v42  ;;  %4400 = vmatprep.subr.mxu0 %v4595_v12  ;;  %vm3573_vm5 = vcmask 1024  }
0x1cf5   :  { %4408 = vmatprep.mubr.msk.f32.mxu0 %vm4596_vm1, %v4595_v12  ;;  %4401 = vmatpush3.msra.mxu0 %v3386_v53  ;;  %vm3365_vm1 = vcmask 254976  }
0x1cf6   :  { %4402 = vmatprep.subr.mxu0 %v4595_v12 }
0x1cf7   :  { %4403 = vmatpush3.msra.mxu0 %v3385_v55 }
0x1cf8   :  { %4404 = vmatprep.subr.mxu0 %v4595_v12 }
0x1cf9   :  { %4405 = vmatpush3.msra.mxu0 %v3384_v57 }
0x1cfa   :  { %4406 = vmatprep.subr.mxu0 %v4595_v12  ;;  %v3767_v12 = vld [vmem:[%s3608_s25] ss:$0 sm:$0xff] }
0x1db4   :  { %v3336_v45 = vpop.f32.mrf.mxu0 }
0x1db5   :  { %3342 = vrot.lane.b32.xlu1 %v3336_v45, %s4594_s14  ;;  %v3340_v47 = vmul.f32 %v5084_v58, %v3336_v45  ;;  %v3383_v58 = vld [vmem:[%s3607_s10] sm:$0xff] }
0x1db6   :  { %v4399_v46 = vpop.f32.mrf.mxu0  ;;  %4407 = vmatpush3.msra.mxu0 %v3383_v58 }
0x1e27   :  { %v3343_v49 = vpop.permute.xlu1 %3342 }
0x1e28   :  { %v3345_v50 = vadd.f32 %v3343_v49, %v3340_v47 }
0x1e2a   :  { %v3351_v52 = vadd.f32 %v3765_v48, %v3345_v50 }
0x1e2c   :  { %vm3352_vm0 = vcmp.gt.f32.partialorder %v3351_v52, 0.0  ;;  %v3358_v54 = vmul.f32 %v3766_v51, %v3351_v52 }
0x1e2e   :  { %v3359_v56 = vsel %vm3352_vm0, %v3351_v52, %v3358_v54 }
0x1e2f   :  { %3361 = vrot.lane.b32.xlu0 %v3359_v56, %s4625_s28 }
0x1ea1   :  { %v3362_v59 = vpop.permute.xlu0 %3361 }
0x1ea2   :  { %v3364_v60 = vmax.f32 %v3359_v56, %v3362_v59 }
0x1ea4   :  { %v3366_v61 = vsel %vm3365_vm1, %v3364_v60, -inf  ;;  %v3374_v62 = vsel %vm3373_vm3, %v3364_v60, -inf }
0x1ea5   :  { %v3367_v63 = vrot.slane %v3366_v61, 4  ;;  %v3375_v0 = vrot.slane %v3374_v62, 4 }
0x1ea7   :  { %v3368_v1 = vmax.f32 %v3366_v61, %v3367_v63  ;;  %v3376_v2 = vmax.f32 %v3374_v62, %v3375_v0 }
0x1ea9   :  { %v3369_v3 = vrot.slane %v3368_v1, 2  ;;  %v3377_v4 = vrot.slane %v3376_v2, 2 }
0x1eab   :  { %v3370_v5 = vmax.f32 %v3368_v1, %v3369_v3  ;;  %v3378_v6 = vmax.f32 %v3376_v2, %v3377_v4 }
0x1ead   :  { %v3371_v7 = vrot.slane %v3370_v5, 1  ;;  %v3379_v8 = vrot.slane %v3378_v6, 1 }
0x1eaf   :  { %v3372_v9 = vmax.f32 %v3370_v5, %v3371_v7  ;;  %v3380_v10 = vmax.f32 %v3378_v6, %v3379_v8 }
0x1eb1   :  { %v3382_v11 = vsel %vm3381_vm4, %v3372_v9, %v3380_v10 }
0x1eb2   :  { %4409 = vmatmul.mubr.msk.f32.vlgmr.msra.gmra.mxu0 %vm709_vm2, %v3382_v11 }
0x1f72   :  { %v3463_v19 = vpop.f32.mrf.mxu0 }
0x1f73   :  { %v3464_v23 = vadd.f32 %v3767_v12, %v3463_v19 }
0x1f74   :  { %v4410_v24 = vpop.f32.mrf.mxu0 }
0x1f75   :  { %vm3467_vm2 = vcmp.gt.f32.partialorder %v3464_v23, 0.0  ;;  %v3475_v25 = vmul.f32 %v3769_v22, %v3464_v23 }
0x1f77   :  { %v3476_v26 = vsel %vm3467_vm2, %v3464_v23, %v3475_v25 }
0x1f78   :  { %4416 = vmatmul.mubr.msk.f32.vlgmr.msra.gmra.mxu1 %vm1535_vm11, %v3476_v26 }
0x2038   :  { %v3555_v28 = vpop.f32.mrf.mxu1 }
0x2039   :  { %v3556_v30 = vadd.f32 %v3770_v27, %v3555_v28 }
0x203a   :  { %v4417_v31 = vpop.f32.mrf.mxu1 }
0x203b   :  { %v3566_v32 = vmul.f32 %v3772_v29, %v3556_v30 }
0x203d   :  { %v3773_v33 = vmul.f32 -1.442695, %v3566_v32 }
0x203f   :  { %4588 = vpow2.f32 %v3773_v33 }
0x204c   :  { %v4589_v20 = vpop.eup %4588 }
0x204d   :  { %v3570_v35 = vadd.f32 1.0, %v4589_v20 }
0x204f   :  { %4590 = vrcp.f32 %v3570_v35 }
0x205c   :  { %v4591_v15 = vpop.eup %4590 }
0x205d   :  { %3574 = vst.msk [vmem:[%s3613_s3] sm:$0x3] %vm3573_vm5, %v4591_v15 }

</bundles_post_ra>
